<compile_context>
chip_gen: v7x
topology: tpu7x:2x2x1
jax: 0.10.0
libtpu: 0.0.40
codegen_flags: <defaults>
</compile_context>

<pallas_src>
import jax
import jax.numpy as jnp
from jax.experimental import pallas as pl
from jax.experimental.pallas import tpu as pltpu

LAMBD = 0.5          # BarlowTwins lambd used by BTwins_loss
SCALE = 1.0          # scale_factor
BN_EPS = 1e-5        # nn.BatchNorm1d default eps


# --------------------------- projector kernel -------------------------------

def _projector_kernel(x_ref, w0_ref, w1_ref, w2_ref, zn_ref):
    """One branch of the projector MLP + final BatchNorm1d(affine=False).

    x_ref : (1, N, D0)   bf16  (block b of the stacked (2, N, D0) input)
    w*_ref: (Din, Dout)  bf16  (resident across both grid steps)
    zn_ref: (1, N, D3)   bf16  (normalized projection for this branch)
    """
    n = x_ref.shape[1]
    inv_n = 1.0 / n

    def bn(y):
        # BatchNorm1d training-mode normalization (biased variance, identity
        # affine), f32 throughout.  Single sweep: sum + sum-of-squares, with a
        # max(var, 0) guard against cancellation.
        s = jnp.sum(y, axis=0, keepdims=True)
        ss = jnp.sum(y * y, axis=0, keepdims=True)
        mean = s * inv_n
        var = jnp.maximum(ss * inv_n - mean * mean, 0.0)
        return (y - mean) * jax.lax.rsqrt(var + BN_EPS)

    def mm(h_bf16, w_ref):
        # bf16 operands at the native MXU rate; accumulate in f32.
        return jnp.dot(h_bf16, w_ref[...], preferred_element_type=jnp.float32)

    h = mm(x_ref[0], w0_ref)                                    # (N, D1) f32
    h = jnp.maximum(bn(h), 0.0).astype(jnp.bfloat16)            # BN -> ReLU
    h = mm(h, w1_ref)                                           # (N, D2) f32
    h = jnp.maximum(bn(h), 0.0).astype(jnp.bfloat16)
    zp = mm(h, w2_ref)                                          # (N, D3) f32
    zn = bn(zp).astype(zn_ref.dtype)                            # final BN (affine=False)
    zn_ref[...] = zn.reshape(zn_ref.shape)


# ------------------------ correlation / loss kernel --------------------------

def _corr_loss_kernel(zn_ref, loss_ref):
    """Barlow Twins loss from the normalized projections, without materializing
    the (D, D) correlation matrix:
        sum(c^2) = sum((z1n z1n^T) * (z2n z2n^T)) / N^2   (two (N, N) Grams)
        diag(c)  = sum(z1n * z2n, axis=0) / N
    """
    n = zn_ref.shape[1]
    inv_n = 1.0 / n

    z1 = zn_ref[0]                                              # (N, D) bf16
    z2 = zn_ref[1]

    # diag(c) from the SAME bf16-rounded operands as the Gram matmuls so the
    # off-diagonal subtraction below stays consistent.
    diag = jnp.sum(z1.astype(jnp.float32) * z2.astype(jnp.float32),
                   axis=0, keepdims=True) * inv_n               # (1, D)

    # Gram matrices: contract along D (lane axis) of both bf16 operands.
    dn = (((1,), (1,)), ((), ()))
    g1 = jax.lax.dot_general(z1, z1, dimension_numbers=dn,
                             preferred_element_type=jnp.float32)  # (N, N)
    g2 = jax.lax.dot_general(z2, z2, dimension_numbers=dn,
                             preferred_element_type=jnp.float32)  # (N, N)

    sum_c2 = jnp.sum(g1 * g2) * (inv_n * inv_n)
    on_diag = jnp.sum((diag - 1.0) ** 2)
    off_diag = sum_c2 - jnp.sum(diag * diag)

    loss_ref[0, 0] = SCALE * (on_diag + LAMBD * off_diag)


# ------------------------------ JAX wrapper ----------------------------------

def _vmem_limit_bytes(estimate_bytes):
    """Scoped-VMEM limit derived from the resident-set estimate, clamped with
    headroom below physical VMEM capacity on every TPU generation."""
    try:
        cap = pltpu.get_tpu_info().vmem_capacity_bytes
    except Exception:
        cap = 64 * 1024 * 1024
    floor = 32 * 1024 * 1024
    return int(min(max(int(estimate_bytes), floor), cap - cap // 8))


def btwins_loss(z1, z2, weights):
    """Full BTwins_loss forward.  weights = [W0, W1, W2], each (D_in, D_out)."""
    n, d0 = z1.shape
    w0, w1, w2 = (w.astype(jnp.bfloat16) for w in weights)
    d1, d2, d3 = w0.shape[1], w1.shape[1], w2.shape[1]
    d_max = max(d0, d1, d2, d3)

    # Stack the two branches on a leading axis AFTER casting to bf16 (halves
    # the staged-operand HBM write vs. concat-then-cast in f32); the branch
    # grid's BlockSpec hands one (N, D0) branch to each grid step.
    x = jnp.stack([z1.astype(jnp.bfloat16), z2.astype(jnp.bfloat16)], axis=0)

    # ---- call 1: per-branch projector + final BN, parallel over branches ----
    w_bytes = 2 * (d0 * d1 + d1 * d2 + d2 * d3)                 # bf16 weights
    proj_est = (2 * w_bytes                                     # weights (+2x buffering)
                + 2 * 2 * n * d0 + 2 * 2 * n * d3               # in/out blocks, 2-deep
                + 6 * 4 * n * d_max)                            # f32 working intermediates
    zn = pl.pallas_call(
        _projector_kernel,
        out_shape=jax.ShapeDtypeStruct((2, n, d3), jnp.bfloat16),
        grid=(2,),
        in_specs=[
            pl.BlockSpec((1, n, d0), lambda b: (b, 0, 0)),
            pl.BlockSpec(w0.shape, lambda b: (0, 0)),           # weights resident
            pl.BlockSpec(w1.shape, lambda b: (0, 0)),
            pl.BlockSpec(w2.shape, lambda b: (0, 0)),
        ],
        out_specs=pl.BlockSpec((1, n, d3), lambda b: (b, 0, 0)),
        compiler_params=pltpu.CompilerParams(
            dimension_semantics=("parallel",),
            vmem_limit_bytes=_vmem_limit_bytes(proj_est)),
    )(x, w0, w1, w2)

    # ---- call 2: Gram-form correlation + loss (scalar via SMEM) ----
    corr_est = (2 * 2 * n * d3                                  # zn (bf16)
                + 2 * 4 * n * n                                 # two (N, N) f32 Grams
                + 2 * 4 * n * d3                                # f32 upcasts / temps
                + (1 << 20))
    loss = pl.pallas_call(
        _corr_loss_kernel,
        out_shape=jax.ShapeDtypeStruct((1, 1), jnp.float32),
        in_specs=[pl.BlockSpec(memory_space=pltpu.VMEM)],
        out_specs=pl.BlockSpec(memory_space=pltpu.SMEM),
        compiler_params=pltpu.CompilerParams(
            vmem_limit_bytes=_vmem_limit_bytes(corr_est)),
    )(zn)
    return loss[0, 0]


# ---------------------------- pure-JAX reference -----------------------------

def btwins_loss_ref(z1, z2, weights):
    """f32 reference matching the PyTorch module (training-mode BatchNorm)."""
    def bn(y):
        m = jnp.mean(y, axis=0, keepdims=True)
        v = jnp.mean((y - m) ** 2, axis=0, keepdims=True)
        return (y - m) / jnp.sqrt(v + BN_EPS)

    def projector(z):
        h = jnp.maximum(bn(z @ weights[0]), 0.0)
        h = jnp.maximum(bn(h @ weights[1]), 0.0)
        return h @ weights[2]

    n = z1.shape[0]
    c = bn(projector(z1)).T @ bn(projector(z2)) / n
    diag = jnp.diagonal(c)
    on_diag = jnp.sum((diag - 1.0) ** 2)
    off_diag = jnp.sum(c * c) - jnp.sum(diag * diag)
    return SCALE * (on_diag + LAMBD * off_diag)


# ---------------------------------- main --------------------------------------

if __name__ == "__main__":
    # Small, TPU-tile-friendly stand-in for proj = [2048, 2048, 2048, 2048].
    N = 64
    SIZES = [256, 256, 256, 256]

    key = jax.random.PRNGKey(0)
    k_z1, k_z2, k_w0, k_w1, k_w2 = jax.random.split(key, 5)

    z1 = jax.random.normal(k_z1, (N, SIZES[0]), dtype=jnp.float32)
    z2 = jax.random.normal(k_z2, (N, SIZES[0]), dtype=jnp.float32)

    def init_w(k, din, dout):
        # Linear(bias=False) weight, stored (in, out).
        return jax.random.normal(k, (din, dout), dtype=jnp.float32) / jnp.sqrt(din)

    weights = [
        init_w(k_w0, SIZES[0], SIZES[1]),
        init_w(k_w1, SIZES[1], SIZES[2]),
        init_w(k_w2, SIZES[2], SIZES[3]),
    ]

    loss = jax.jit(btwins_loss)(z1, z2, weights)
    jax.block_until_ready(loss)

    ref = btwins_loss_ref(z1, z2, weights)
    assert jnp.isfinite(loss), loss
    # bf16 matmul operands in the kernel vs. the f32 reference -> loose tolerance.
    assert abs(float(loss) - float(ref)) <= 0.1 * abs(float(ref)) + 1e-2, (loss, ref)
    print("KERNEL_OK")
</pallas_src>

<mosaic_0001>
module attributes {stable_mosaic.version = 11 : i64} {
  func.func @_projector_kernel(%arg0: i32, %arg1: memref<1x64x256xbf16, #tpu.memory_space<vmem>>, %arg2: memref<256x256xbf16, #tpu.memory_space<vmem>>, %arg3: memref<256x256xbf16, #tpu.memory_space<vmem>>, %arg4: memref<256x256xbf16, #tpu.memory_space<vmem>>, %arg5: memref<1x64x256xbf16, #tpu.memory_space<vmem>>) attributes {dimension_semantics = [#tpu.dimension_semantics<parallel>], iteration_bounds = array<i64: 2>, scalar_prefetch = 0 : i64, scratch_operands = 0 : i64, tpu.core_type = #tpu.core_type<tc>, window_params = [{transform_indices = @transform_0, window_bounds = array<i64: 1, 64, 256>}, {pipeline_mode = #tpu.pipeline_mode<synchronous>, transform_indices = @transform_1, window_bounds = array<i64: 256, 256>}, {pipeline_mode = #tpu.pipeline_mode<synchronous>, transform_indices = @transform_2, window_bounds = array<i64: 256, 256>}, {pipeline_mode = #tpu.pipeline_mode<synchronous>, transform_indices = @transform_3, window_bounds = array<i64: 256, 256>}, {transform_indices = @transform_4, window_bounds = array<i64: 1, 64, 256>}]} {
    %c0 = arith.constant 0 : index
    %c0_0 = arith.constant 0 : index
    %c0_1 = arith.constant 0 : index
    %0 = vector.load %arg1[%c0, %c0_0, %c0_1] : memref<1x64x256xbf16, #tpu.memory_space<vmem>>, vector<1x64x256xbf16>
    %1 = vector.shape_cast %0 : vector<1x64x256xbf16> to vector<64x256xbf16>
    %c0_2 = arith.constant 0 : index
    %c0_3 = arith.constant 0 : index
    %2 = vector.load %arg2[%c0_2, %c0_3] : memref<256x256xbf16, #tpu.memory_space<vmem>>, vector<256x256xbf16>
    %cst = arith.constant dense<0.000000e+00> : vector<64x256xf32>
    %3 = tpu.matmul %1, %2, %cst {dimension_numbers = #tpu.dot_dimension_numbers<[1], [0], [0], [1], [0, 0, 1, 1], [], []>} : vector<64x256xbf16>, vector<256x256xbf16>, vector<64x256xf32> -> vector<64x256xf32>
    %cst_4 = arith.constant dense<0.000000e+00> : vector<256xf32>
    %4 = vector.multi_reduction <add>, %3, %cst_4 [0] : vector<64x256xf32> to vector<256xf32>
    %5 = vector.shape_cast %4 : vector<256xf32> to vector<1x256xf32>
    %6 = arith.mulf %3, %3 : vector<64x256xf32>
    %cst_5 = arith.constant dense<0.000000e+00> : vector<256xf32>
    %7 = vector.multi_reduction <add>, %6, %cst_5 [0] : vector<64x256xf32> to vector<256xf32>
    %8 = vector.shape_cast %7 : vector<256xf32> to vector<1x256xf32>
    %cst_6 = arith.constant 1.562500e-02 : f32
    %9 = vector.broadcast %cst_6 : f32 to vector<1x256xf32>
    %10 = arith.mulf %5, %9 : vector<1x256xf32>
    %cst_7 = arith.constant 1.562500e-02 : f32
    %11 = vector.broadcast %cst_7 : f32 to vector<1x256xf32>
    %12 = arith.mulf %8, %11 : vector<1x256xf32>
    %13 = arith.mulf %10, %10 : vector<1x256xf32>
    %14 = arith.subf %12, %13 : vector<1x256xf32>
    %cst_8 = arith.constant 0.000000e+00 : f32
    %15 = vector.broadcast %cst_8 : f32 to vector<1x256xf32>
    %16 = arith.maximumf %14, %15 : vector<1x256xf32>
    %17 = vector.broadcast %10 : vector<1x256xf32> to vector<64x256xf32>
    %18 = arith.subf %3, %17 : vector<64x256xf32>
    %cst_9 = arith.constant 9.99999974E-6 : f32
    %19 = vector.broadcast %cst_9 : f32 to vector<1x256xf32>
    %20 = arith.addf %16, %19 : vector<1x256xf32>
    %21 = math.rsqrt %20 : vector<1x256xf32>
    %22 = vector.broadcast %21 : vector<1x256xf32> to vector<64x256xf32>
    %23 = arith.mulf %18, %22 : vector<64x256xf32>
    %cst_10 = arith.constant 0.000000e+00 : f32
    %24 = vector.broadcast %cst_10 : f32 to vector<64x256xf32>
    %25 = arith.maximumf %23, %24 : vector<64x256xf32>
    %26 = arith.truncf %25 : vector<64x256xf32> to vector<64x256xbf16>
    %c0_11 = arith.constant 0 : index
    %c0_12 = arith.constant 0 : index
    %27 = vector.load %arg3[%c0_11, %c0_12] : memref<256x256xbf16, #tpu.memory_space<vmem>>, vector<256x256xbf16>
    %cst_13 = arith.constant dense<0.000000e+00> : vector<64x256xf32>
    %28 = tpu.matmul %26, %27, %cst_13 {dimension_numbers = #tpu.dot_dimension_numbers<[1], [0], [0], [1], [0, 0, 1, 1], [], []>} : vector<64x256xbf16>, vector<256x256xbf16>, vector<64x256xf32> -> vector<64x256xf32>
    %cst_14 = arith.constant dense<0.000000e+00> : vector<256xf32>
    %29 = vector.multi_reduction <add>, %28, %cst_14 [0] : vector<64x256xf32> to vector<256xf32>
    %30 = vector.shape_cast %29 : vector<256xf32> to vector<1x256xf32>
    %31 = arith.mulf %28, %28 : vector<64x256xf32>
    %cst_15 = arith.constant dense<0.000000e+00> : vector<256xf32>
    %32 = vector.multi_reduction <add>, %31, %cst_15 [0] : vector<64x256xf32> to vector<256xf32>
    %33 = vector.shape_cast %32 : vector<256xf32> to vector<1x256xf32>
    %cst_16 = arith.constant 1.562500e-02 : f32
    %34 = vector.broadcast %cst_16 : f32 to vector<1x256xf32>
    %35 = arith.mulf %30, %34 : vector<1x256xf32>
    %cst_17 = arith.constant 1.562500e-02 : f32
    %36 = vector.broadcast %cst_17 : f32 to vector<1x256xf32>
    %37 = arith.mulf %33, %36 : vector<1x256xf32>
    %38 = arith.mulf %35, %35 : vector<1x256xf32>
    %39 = arith.subf %37, %38 : vector<1x256xf32>
    %cst_18 = arith.constant 0.000000e+00 : f32
    %40 = vector.broadcast %cst_18 : f32 to vector<1x256xf32>
    %41 = arith.maximumf %39, %40 : vector<1x256xf32>
    %42 = vector.broadcast %35 : vector<1x256xf32> to vector<64x256xf32>
    %43 = arith.subf %28, %42 : vector<64x256xf32>
    %cst_19 = arith.constant 9.99999974E-6 : f32
    %44 = vector.broadcast %cst_19 : f32 to vector<1x256xf32>
    %45 = arith.addf %41, %44 : vector<1x256xf32>
    %46 = math.rsqrt %45 : vector<1x256xf32>
    %47 = vector.broadcast %46 : vector<1x256xf32> to vector<64x256xf32>
    %48 = arith.mulf %43, %47 : vector<64x256xf32>
    %cst_20 = arith.constant 0.000000e+00 : f32
    %49 = vector.broadcast %cst_20 : f32 to vector<64x256xf32>
    %50 = arith.maximumf %48, %49 : vector<64x256xf32>
    %51 = arith.truncf %50 : vector<64x256xf32> to vector<64x256xbf16>
    %c0_21 = arith.constant 0 : index
    %c0_22 = arith.constant 0 : index
    %52 = vector.load %arg4[%c0_21, %c0_22] : memref<256x256xbf16, #tpu.memory_space<vmem>>, vector<256x256xbf16>
    %cst_23 = arith.constant dense<0.000000e+00> : vector<64x256xf32>
    %53 = tpu.matmul %51, %52, %cst_23 {dimension_numbers = #tpu.dot_dimension_numbers<[1], [0], [0], [1], [0, 0, 1, 1], [], []>} : vector<64x256xbf16>, vector<256x256xbf16>, vector<64x256xf32> -> vector<64x256xf32>
    %cst_24 = arith.constant dense<0.000000e+00> : vector<256xf32>
    %54 = vector.multi_reduction <add>, %53, %cst_24 [0] : vector<64x256xf32> to vector<256xf32>
    %55 = vector.shape_cast %54 : vector<256xf32> to vector<1x256xf32>
    %56 = arith.mulf %53, %53 : vector<64x256xf32>
    %cst_25 = arith.constant dense<0.000000e+00> : vector<256xf32>
    %57 = vector.multi_reduction <add>, %56, %cst_25 [0] : vector<64x256xf32> to vector<256xf32>
    %58 = vector.shape_cast %57 : vector<256xf32> to vector<1x256xf32>
    %cst_26 = arith.constant 1.562500e-02 : f32
    %59 = vector.broadcast %cst_26 : f32 to vector<1x256xf32>
    %60 = arith.mulf %55, %59 : vector<1x256xf32>
    %cst_27 = arith.constant 1.562500e-02 : f32
    %61 = vector.broadcast %cst_27 : f32 to vector<1x256xf32>
    %62 = arith.mulf %58, %61 : vector<1x256xf32>
    %63 = arith.mulf %60, %60 : vector<1x256xf32>
    %64 = arith.subf %62, %63 : vector<1x256xf32>
    %cst_28 = arith.constant 0.000000e+00 : f32
    %65 = vector.broadcast %cst_28 : f32 to vector<1x256xf32>
    %66 = arith.maximumf %64, %65 : vector<1x256xf32>
    %67 = vector.broadcast %60 : vector<1x256xf32> to vector<64x256xf32>
    %68 = arith.subf %53, %67 : vector<64x256xf32>
    %cst_29 = arith.constant 9.99999974E-6 : f32
    %69 = vector.broadcast %cst_29 : f32 to vector<1x256xf32>
    %70 = arith.addf %66, %69 : vector<1x256xf32>
    %71 = math.rsqrt %70 : vector<1x256xf32>
    %72 = vector.broadcast %71 : vector<1x256xf32> to vector<64x256xf32>
    %73 = arith.mulf %68, %72 : vector<64x256xf32>
    %74 = arith.truncf %73 : vector<64x256xf32> to vector<64x256xbf16>
    %75 = vector.shape_cast %74 : vector<64x256xbf16> to vector<1x64x256xbf16>
    %c0_30 = arith.constant 0 : index
    %c0_31 = arith.constant 0 : index
    %c0_32 = arith.constant 0 : index
    %76 = vector.load %arg5[%c0_30, %c0_31, %c0_32] : memref<1x64x256xbf16, #tpu.memory_space<vmem>>, vector<1x64x256xbf16>
    tpu.vector_store %arg5[%c0_30, %c0_31, %c0_32], %75 {strides = array<i32>} : memref<1x64x256xbf16, #tpu.memory_space<vmem>>, vector<1x64x256xbf16>,
    return
  }
  func.func @transform_0(%arg0: i32) -> (i32, i32, i32) {
    %c0_i32 = arith.constant 0 : i32
    %c0_i32_0 = arith.constant 0 : i32
    %c0_i32_1 = arith.constant 0 : i32
    return %arg0, %c0_i32, %c0_i32_0 : i32, i32, i32
  }
  func.func @transform_1(%arg0: i32) -> (i32, i32) {
    %c0_i32 = arith.constant 0 : i32
    %c0_i32_0 = arith.constant 0 : i32
    %c0_i32_1 = arith.constant 0 : i32
    return %c0_i32, %c0_i32_0 : i32, i32
  }
  func.func @transform_2(%arg0: i32) -> (i32, i32) {
    %c0_i32 = arith.constant 0 : i32
    %c0_i32_0 = arith.constant 0 : i32
    %c0_i32_1 = arith.constant 0 : i32
    return %c0_i32, %c0_i32_0 : i32, i32
  }
  func.func @transform_3(%arg0: i32) -> (i32, i32) {
    %c0_i32 = arith.constant 0 : i32
    %c0_i32_0 = arith.constant 0 : i32
    %c0_i32_1 = arith.constant 0 : i32
    return %c0_i32, %c0_i32_0 : i32, i32
  }
  func.func @transform_4(%arg0: i32) -> (i32, i32, i32) {
    %c0_i32 = arith.constant 0 : i32
    %c0_i32_0 = arith.constant 0 : i32
    %c0_i32_1 = arith.constant 0 : i32
    return %arg0, %c0_i32, %c0_i32_0 : i32, i32, i32
  }
}

module attributes {stable_mosaic.version = 11 : i64} {
  func.func @_corr_loss_kernel(%arg0: memref<2x64x256xbf16, #tpu.memory_space<vmem>>, %arg1: memref<1x1xf32, #tpu.memory_space<smem>>) attributes {dimension_semantics = [], scalar_prefetch = 0 : i64, scratch_operands = 0 : i64, tpu.core_type = #tpu.core_type<tc>} {
    %c0 = arith.constant 0 : index
    %c0_0 = arith.constant 0 : index
    %c0_1 = arith.constant 0 : index
    %0 = vector.load %arg0[%c0, %c0_0, %c0_1] : memref<2x64x256xbf16, #tpu.memory_space<vmem>>, vector<1x64x256xbf16>
    %1 = vector.shape_cast %0 : vector<1x64x256xbf16> to vector<64x256xbf16>
    %c1 = arith.constant 1 : index
    %c0_2 = arith.constant 0 : index
    %c0_3 = arith.constant 0 : index
    %2 = vector.load %arg0[%c1, %c0_2, %c0_3] : memref<2x64x256xbf16, #tpu.memory_space<vmem>>, vector<1x64x256xbf16>
    %3 = vector.shape_cast %2 : vector<1x64x256xbf16> to vector<64x256xbf16>
    %4 = arith.extf %1 : vector<64x256xbf16> to vector<64x256xf32>
    %5 = arith.extf %3 : vector<64x256xbf16> to vector<64x256xf32>
    %6 = arith.mulf %4, %5 : vector<64x256xf32>
    %cst = arith.constant dense<0.000000e+00> : vector<256xf32>
    %7 = vector.multi_reduction <add>, %6, %cst [0] : vector<64x256xf32> to vector<256xf32>
    %8 = vector.shape_cast %7 : vector<256xf32> to vector<1x256xf32>
    %cst_4 = arith.constant 1.562500e-02 : f32
    %9 = vector.broadcast %cst_4 : f32 to vector<1x256xf32>
    %10 = arith.mulf %8, %9 : vector<1x256xf32>
    %cst_5 = arith.constant dense<0.000000e+00> : vector<64x64xf32>
    %11 = tpu.matmul %1, %1, %cst_5 {dimension_numbers = #tpu.dot_dimension_numbers<[1], [1], [0], [0], [0, 0, 1, 0], [], []>} : vector<64x256xbf16>, vector<64x256xbf16>, vector<64x64xf32> -> vector<64x64xf32>
    %cst_6 = arith.constant dense<0.000000e+00> : vector<64x64xf32>
    %12 = tpu.matmul %3, %3, %cst_6 {dimension_numbers = #tpu.dot_dimension_numbers<[1], [1], [0], [0], [0, 0, 1, 0], [], []>} : vector<64x256xbf16>, vector<64x256xbf16>, vector<64x64xf32> -> vector<64x64xf32>
    %13 = arith.mulf %11, %12 : vector<64x64xf32>
    %14 = vector.shape_cast %13 : vector<64x64xf32> to vector<1x64x64xf32>
    %cst_7 = arith.constant dense<0.000000e+00> : vector<1xf32>
    %15 = vector.multi_reduction <add>, %14, %cst_7 [1, 2] : vector<1x64x64xf32> to vector<1xf32>
    %16 = vector.shape_cast %15 : vector<1xf32> to vector<1x1x1xf32>
    %17 = vector.extract %16[0, 0, 0] : f32 from vector<1x1x1xf32>
    %cst_8 = arith.constant 2.44140625E-4 : f32
    %18 = arith.mulf %17, %cst_8 : f32
    %cst_9 = arith.constant 1.000000e+00 : f32
    %19 = vector.broadcast %cst_9 : f32 to vector<1x256xf32>
    %20 = arith.subf %10, %19 : vector<1x256xf32>
    %21 = arith.mulf %20, %20 : vector<1x256xf32>
    %22 = vector.shape_cast %21 : vector<1x256xf32> to vector<1x1x256xf32>
    %cst_10 = arith.constant dense<0.000000e+00> : vector<1xf32>
    %23 = vector.multi_reduction <add>, %22, %cst_10 [1, 2] : vector<1x1x256xf32> to vector<1xf32>
    %24 = vector.shape_cast %23 : vector<1xf32> to vector<1x1x1xf32>
    %25 = vector.extract %24[0, 0, 0] : f32 from vector<1x1x1xf32>
    %26 = arith.mulf %10, %10 : vector<1x256xf32>
    %27 = vector.shape_cast %26 : vector<1x256xf32> to vector<1x1x256xf32>
    %cst_11 = arith.constant dense<0.000000e+00> : vector<1xf32>
    %28 = vector.multi_reduction <add>, %27, %cst_11 [1, 2] : vector<1x1x256xf32> to vector<1xf32>
    %29 = vector.shape_cast %28 : vector<1xf32> to vector<1x1x1xf32>
    %30 = vector.extract %29[0, 0, 0] : f32 from vector<1x1x1xf32>
    %31 = arith.subf %18, %30 : f32
    %cst_12 = arith.constant 5.000000e-01 : f32
    %32 = arith.mulf %cst_12, %31 : f32
    %33 = arith.addf %25, %32 : f32
    %cst_13 = arith.constant 1.000000e+00 : f32
    %34 = arith.mulf %cst_13, %33 : f32
    %c0_14 = arith.constant 0 : index
    %c0_15 = arith.constant 0 : index
    %35 = memref.load %arg1[%c0_14, %c0_15] : memref<1x1xf32, #tpu.memory_space<smem>>
    memref.store %34, %arg1[%c0_14, %c0_15] : memref<1x1xf32, #tpu.memory_space<smem>>
    return
  }
}

</mosaic_0001>

<bundles_post_ra>
// kernel: btwins_loss.3
= control target key start
LH: loop header
LB: loop body
LE: loop exit
PB: predicated region body
PF: predicated region fallthrough
CT: control target
= control target key end

     0   :  { %s561_s0 = inlined_call_operand.vmem [shape: bf16[2,64,256], index: 0, kind: input, shape index: {}]   ;;  %s562_s1 = inlined_call_operand.hbm [shape: f32[1,1], index: 1, kind: output, shape index: {}]  }
   0x1   :  { %v10_v0 = vld [vmem:[%s561_s0] sm:$0xff]  ;;  %v11_v1 = vld [vmem:[%s561_s0 + $0x8] sm:$0xff]  ;;  %v12_v8 = vld [vmem:[%s561_s0 + $0x10] sm:$0xff] }
   0x2   :  { %v396_v2 = vld [vmem:[%s561_s0 + $0x40] sm:$0xff]  ;;  %v397_v3 = vld [vmem:[%s561_s0 + $0x48] sm:$0xff]  ;;  %v405_v4 = vcombine.high %v10_v0, %v11_v1  ;;  %v404_v6 = vcombine.low %v10_v0, %v11_v1  ;;  %v13_v9 = vld [vmem:[%s561_s0 + $0x18] sm:$0xff] }
   0x3   :  { %v413_v5 = vcombine.high %v396_v2, %v397_v3  ;;  %v412_v7 = vcombine.low %v396_v2, %v397_v3  ;;  %v398_v10 = vld [vmem:[%s561_s0 + $0x50] sm:$0xff]  ;;  %v399_v11 = vld [vmem:[%s561_s0 + $0x58] sm:$0xff] }
   0x4   :  { %143 = vmatprep.subr.bf16.mxu0 %v405_v4  ;;  %175 = vmatprep.mubr.bf16.mxu0 %v405_v4 }
   0x5   :  { %248 = vmatprep.subr.bf16.mxu1 %v413_v5  ;;  %144 = vmatpush1.bf16.xpose.msra.mxu0 %v404_v6 }
   0x6   :  { %6 = vsyncpa [#allocation3], 0  ;;  %457 = vmul.bf16.f32.vacc0 %v396_v2, %v10_v0  ;;  %249 = vmatpush1.bf16.xpose.msra.mxu1 %v412_v7  ;;  %v407_v12 = vcombine.high %v12_v8, %v13_v9  ;;  %280 = vmatprep.mubr.bf16.mxu1 %v413_v5  ;;  %v415_v13 = vcombine.high %v398_v10, %v399_v11  ;;  %v14_v16 = vld [vmem:[%s561_s0 + $0x20] sm:$0xff]  ;;  %v15_v17 = vld [vmem:[%s561_s0 + $0x28] sm:$0xff]  ;;  %v481_v36 = vmov 1935823168  }
   0x7   :  { %458 = vmac.bf16.f32.vacc0 %v397_v3, %v11_v1  ;;  %v406_v14 = vcombine.low %v12_v8, %v13_v9  ;;  %v414_v15 = vcombine.low %v398_v10, %v399_v11  ;;  %v400_v18 = vld [vmem:[%s561_s0 + $0x60] sm:$0xff]  ;;  %v401_v19 = vld [vmem:[%s561_s0 + $0x68] sm:$0xff]  ;;  %v409_v20 = vcombine.high %v14_v16, %v15_v17  ;;  %v16_v22 = vld [vmem:[%s561_s0 + $0x30] sm:$0xff]  ;;  %s445_s17 = scalar_lea.hbm %s562_s1, 16 }
   0x8   :  { %145 = vmatprep.subr.bf16.mxu0 %v407_v12  ;;  %250 = vmatprep.subr.bf16.mxu1 %v415_v13  ;;  %459 = vmac.bf16.f32.vacc0 %v398_v10, %v12_v8  ;;  %v417_v21 = vcombine.high %v400_v18, %v401_v19  ;;  %v17_v23 = vld [vmem:[%s561_s0 + $0x38] sm:$0xff]  ;;  %v402_v24 = vld [vmem:[%s561_s0 + $0x70] sm:$0xff]  ;;  %v408_v26 = vcombine.low %v14_v16, %v15_v17  ;;  %v469_v37 = vunpack.c.l.s4 %v481_v36  ;;  %p446_p0 = scmp.ne.s32.totalorder %s562_s1, %s445_s17  ;;  %p449_p1 = scmp.lt.u32.totalorder %s445_s17, %s562_s1 }
   0x9   :  { %460 = vmac.bf16.f32.vacc0 %v399_v11, %v13_v9  ;;  %v403_v25 = vld [vmem:[%s561_s0 + $0x78] sm:$0xff]  ;;  %v416_v27 = vcombine.low %v400_v18, %v401_v19  ;;  %v411_v28 = vcombine.high %v16_v22, %v17_v23  ;;  %v410_v30 = vcombine.low %v16_v22, %v17_v23 }
   0xa   :  { %461 = vmac.bf16.f32.vacc0 %v400_v18, %v14_v16  ;;  %v419_v29 = vcombine.high %v402_v24, %v403_v25  ;;  %v418_v31 = vcombine.low %v402_v24, %v403_v25  ;;  %v470_v38 = vunpack.c.0.s8 %v469_v37  ;;  %p451_p2 = pnand %p449_p1, %p446_p0 }
   0xb   :  { %462 = vmac.bf16.f32.vacc0 %v401_v19, %v15_v17  ;;  %v471_v39 = vlaneseq  ;;  %vm351_vm0 = vcmask 1040384   ;;  %vm321_vm1 = vcmask 523264  }
   0xc   :  { %463 = vmac.bf16.f32.vacc0 %v402_v24, %v16_v22 }
   0xd   :  { %146 = vmatpush1.bf16.xpose.msra.mxu0 %v406_v14  ;;  %464 = vmac.bf16.f32.vacc0 %v403_v25, %v17_v23  ;;  %v472_v40 = vshrl.u32 %v471_v39, 7 }
   0xe   :  { %251 = vmatpush1.bf16.xpose.msra.mxu1 %v414_v15  ;;  %147 = vmatprep.subr.bf16.mxu0 %v409_v20 }
   0xf   :  { %252 = vmatprep.subr.bf16.mxu1 %v417_v21  ;;  %v465_v32 = vmovacc.add.low.vacc0  ;;  %v473_v41 = vsub.s32 %v470_v38, %v472_v40 }
  0x10   :  { %v466_v33 = vmovacc.add.high.vacc0 }
  0x12   :  { %v467_v34 = vcombine.low %v465_v32, %v466_v33  ;;  %v468_v35 = vcombine.high %v465_v32, %v466_v33 }
  0x14   :  { %v474_v42 = vrot.slane %v467_v34, %v473_v41  ;;  %v480_v43 = vrot.slane %v468_v35, %v473_v41 }
  0x15   :  { %148 = vmatpush1.bf16.xpose.msra.mxu0 %v408_v26 }
  0x16   :  { %253 = vmatpush1.bf16.xpose.msra.mxu1 %v416_v27  ;;  %149 = vmatprep.subr.bf16.mxu0 %v411_v28  ;;  %v82_v44 = vrot.slane %v474_v42, 4  ;;  %v95_v45 = vrot.slane %v480_v43, 4 }
  0x17   :  { %254 = vmatprep.subr.bf16.mxu1 %v419_v29 }
  0x18   :  { %v83_v46 = vadd.f32 %v474_v42, %v82_v44  ;;  %v96_v47 = vadd.f32 %v480_v43, %v95_v45 }
  0x1a   :  { %v84_v48 = vrot.slane %v83_v46, 2  ;;  %v97_v49 = vrot.slane %v96_v47, 2 }
  0x1c   :  { %v85_v50 = vadd.f32 %v84_v48, %v83_v46  ;;  %v98_v51 = vadd.f32 %v97_v49, %v96_v47 }
  0x1d   :  { %150 = vmatpush1.bf16.xpose.msra.mxu0 %v410_v30 }
  0x1e   :  { %255 = vmatpush1.bf16.xpose.msra.mxu1 %v418_v31  ;;  %v86_v52 = vrot.slane %v85_v50, 1  ;;  %v99_v53 = vrot.slane %v98_v51, 1 }
  0x20   :  { %v87_v54 = vadd.f32 %v86_v52, %v85_v50  ;;  %v100_v55 = vadd.f32 %v99_v53, %v98_v51 }
  0x22   :  { %v101_v56 = vmul.f32 0.015625, %v87_v54  ;;  %v102_v57 = vmul.f32 0.015625, %v100_v55 }
  0x24   :  { %176 = vmatmul.mubr.bf16.vlgmr.msra.gmra.mrb[0].mxu0 %v404_v6  ;;  %v364_v58 = vmul.f32 %v101_v56, %v101_v56  ;;  %v365_v59 = vmul.f32 %v102_v57, %v102_v57  ;;  %v420_v63 = vadd.f32 -1.0, %v101_v56  ;;  %v421_v0 = vadd.f32 -1.0, %v102_v57 }
  0x25   :  { %281 = vmatmul.mubr.bf16.vlgmr.msra.gmra.mrb[0].mxu1 %v412_v7  ;;  %183 = vmatprep.mubr.bf16.mxu0 %v407_v12 }
  0x26   :  { %288 = vmatprep.mubr.bf16.mxu1 %v415_v13  ;;  %v366_v60 = vsel %vm351_vm0, %v364_v58, 0.0  ;;  %v367_v61 = vsel %vm351_vm0, %v365_v59, 0.0  ;;  %v349_v1 = vmul.f32 %v420_v63, %v420_v63  ;;  %v350_v2 = vmul.f32 %v421_v0, %v421_v0 }
  0x27   :  { %v368_v62 = vadd.f32 %v367_v61, %v366_v60 }
  0x28   :  { %v352_v3 = vsel %vm351_vm0, %v349_v1, 0.0  ;;  %v353_v4 = vsel %vm351_vm0, %v350_v2, 0.0 }
  0x29   :  { %369 = vadd.xlane.f32.xlu1 %v368_v62  ;;  %v354_v5 = vadd.f32 %v353_v4, %v352_v3 }
  0x2c   :  { %184 = vmatmul.mubr.bf16.gmra.mrb[4].mxu0 %v406_v14 }
  0x2d   :  { %289 = vmatmul.mubr.bf16.gmra.mrb[4].mxu1 %v414_v15  ;;  %191 = vmatprep.mubr.bf16.mxu0 %v409_v20 }
  0x2e   :  { %296 = vmatprep.mubr.bf16.mxu1 %v417_v21 }
  0x34   :  { %192 = vmatmul.mubr.bf16.gmra.mrb[8].mxu0 %v408_v26 }
  0x35   :  { %297 = vmatmul.mubr.bf16.gmra.mrb[8].mxu1 %v416_v27  ;;  %199 = vmatprep.mubr.bf16.mxu0 %v411_v28 }
  0x36   :  { %304 = vmatprep.mubr.bf16.mxu1 %v419_v29 }
  0x3c   :  { %200 = vmatmul.mubr.bf16.gmra.mrb[12].mxu0 %v410_v30 }
  0x3d   :  { %305 = vmatmul.mubr.bf16.gmra.mrb[12].mxu1 %v418_v31 }
  0xb6   :  { %v370_v61 = vpop.xlane.xlu1 %369 }
  0xb7   :  { %v371_v62 = vrot.slane %v370_v61, 4 }
  0xb9   :  { %v372_v63 = vadd.f32 %v371_v62, %v370_v61 }
  0xbb   :  { %v373_v3 = vrot.slane %v372_v63, 2 }
  0xf7   :  { %v177_v6 = vpop.f32.mrb[0].mxu0 }
  0xf8   :  { %v282_v7 = vpop.f32.mrb[0].mxu1  ;;  %v179_v8 = vpop.f32.mrb[1].mxu0 }
  0xf9   :  { %v313_v9 = vmul.f32 %v282_v7, %v177_v6  ;;  %v284_v10 = vpop.f32.mrb[1].mxu1  ;;  %v180_v11 = vpop.f32.mrb[2].mxu0 }
  0xfa   :  { %v285_v12 = vpop.f32.mrb[2].mxu1  ;;  %v182_v13 = vpop.f32.mrb[3].mxu0  ;;  %v374_v10 = vadd.f32 %v373_v3, %v372_v63 }
  0xfb   :  { %v314_v14 = vmul.f32 %v285_v12, %v180_v11  ;;  %v287_v15 = vpop.f32.mrb[3].mxu1  ;;  %v322_v16 = vsel %vm321_vm1, %v313_v9, 0.0 }
  0xfc   :  { %v375_v15 = vrot.slane %v374_v10, 1 }
  0xfd   :  { %v323_v17 = vsel %vm321_vm1, %v314_v14, 0.0 }
  0xfe   :  { %v324_v18 = vadd.f32 %v323_v17, %v322_v16  ;;  %v376_v17 = vadd.f32 %v375_v15, %v374_v10 }
  0xff   :  { %v185_v19 = vpop.f32.mrb[4].mxu0 }
 0x100   :  { %v290_v20 = vpop.f32.mrb[4].mxu1  ;;  %v187_v21 = vpop.f32.mrb[5].mxu0 }
 0x101   :  { %v315_v22 = vmul.f32 %v290_v20, %v185_v19  ;;  %v292_v23 = vpop.f32.mrb[5].mxu1  ;;  %v188_v24 = vpop.f32.mrb[6].mxu0 }
 0x102   :  { %v293_v25 = vpop.f32.mrb[6].mxu1  ;;  %v190_v26 = vpop.f32.mrb[7].mxu0 }
 0x103   :  { %v325_v27 = vsel %vm321_vm1, %v315_v22, 0.0  ;;  %v316_v28 = vmul.f32 %v293_v25, %v188_v24  ;;  %v295_v29 = vpop.f32.mrb[7].mxu1 }
 0x104   :  { %v326_v30 = vadd.f32 %v325_v27, %v324_v18 }
 0x105   :  { %v327_v31 = vsel %vm321_vm1, %v316_v28, 0.0 }
 0x106   :  { %v328_v32 = vadd.f32 %v327_v31, %v326_v30 }
 0x107   :  { %v193_v33 = vpop.f32.mrb[8].mxu0 }
 0x108   :  { %v298_v34 = vpop.f32.mrb[8].mxu1  ;;  %v195_v35 = vpop.f32.mrb[9].mxu0 }
 0x109   :  { %v317_v36 = vmul.f32 %v298_v34, %v193_v33  ;;  %v300_v37 = vpop.f32.mrb[9].mxu1  ;;  %v196_v38 = vpop.f32.mrb[10].mxu0 }
 0x10a   :  { %v301_v39 = vpop.f32.mrb[10].mxu1  ;;  %v198_v40 = vpop.f32.mrb[11].mxu0 }
 0x10b   :  { %v329_v41 = vsel %vm321_vm1, %v317_v36, 0.0  ;;  %v318_v42 = vmul.f32 %v301_v39, %v196_v38  ;;  %v303_v43 = vpop.f32.mrb[11].mxu1 }
 0x10c   :  { %v330_v44 = vadd.f32 %v329_v41, %v328_v32 }
 0x10d   :  { %v331_v45 = vsel %vm321_vm1, %v318_v42, 0.0 }
 0x10e   :  { %v332_v46 = vadd.f32 %v331_v45, %v330_v44 }
 0x10f   :  { %v201_v47 = vpop.f32.mrb[12].mxu0 }
 0x110   :  { %v306_v48 = vpop.f32.mrb[12].mxu1  ;;  %v203_v49 = vpop.f32.mrb[13].mxu0 }
 0x111   :  { %v319_v50 = vmul.f32 %v306_v48, %v201_v47  ;;  %v308_v51 = vpop.f32.mrb[13].mxu1  ;;  %v204_v52 = vpop.f32.mrb[14].mxu0 }
 0x112   :  { %v309_v53 = vpop.f32.mrb[14].mxu1  ;;  %v206_v54 = vpop.f32.mrb[15].mxu0 }
 0x113   :  { %v333_v55 = vsel %vm321_vm1, %v319_v50, 0.0  ;;  %v320_v56 = vmul.f32 %v309_v53, %v204_v52  ;;  %v311_v57 = vpop.f32.mrb[15].mxu1 }
 0x114   :  { %v334_v58 = vadd.f32 %v333_v55, %v332_v46 }
 0x115   :  { %v335_v59 = vsel %vm321_vm1, %v320_v56, 0.0 }
 0x116   :  { %v336_v60 = vadd.f32 %v335_v59, %v334_v58 }
 0x118   :  { %337 = vadd.xlane.f32.xlu0 %v336_v60 }
 0x11c   :  { %355 = vadd.xlane.f32.xlu0 %v354_v5 }
 0x1a5   :  { %v338_v0 = vpop.xlane.xlu0 %337 }
 0x1a6   :  { %v339_v1 = vrot.slane %v338_v0, 4 }
 0x1a8   :  { %v340_v2 = vadd.f32 %v339_v1, %v338_v0 }
 0x1a9   :  { %v356_v4 = vpop.xlane.xlu0 %355 }
 0x1aa   :  { %v341_v6 = vrot.slane %v340_v2, 2  ;;  %v357_v7 = vrot.slane %v356_v4, 4 }
 0x1ac   :  { %v358_v8 = vadd.f32 %v357_v7, %v356_v4  ;;  %v342_v9 = vadd.f32 %v341_v6, %v340_v2 }
 0x1ae   :  { %v359_v11 = vrot.slane %v358_v8, 2  ;;  %v343_v12 = vrot.slane %v342_v9, 1 }
 0x1b0   :  { %v360_v13 = vadd.f32 %v359_v11, %v358_v8  ;;  %v344_v14 = vadd.f32 %v343_v12, %v342_v9 }
 0x1b2   :  { %422 = vpush %v344_v14  ;;  %v361_v5 = vrot.slane %v360_v13, 1 }
 0x1b4   :  { %v362_v16 = vadd.f32 %v361_v5, %v360_v13 }
 0x1b6   :  { %424 = vpush %v362_v16 }
 0x1b7   :  { %426 = vpush %v376_v17 }
 0x1e3   :  { %s423_s0 = spop %422 }
 0x1e4   :  { %s346_s9 = smul.f32 0.00024414063, %s423_s0 }
 0x1e7   :  { %s425_s10 = spop %424 }
 0x1e8   :  { %s427_s11 = spop %426 }
 0x1e9   :  { %s378_s12 = ssub.f32 %s346_s9, %s427_s11 }
 0x1eb   :  { %s379_s13 = smul.f32 0.5, %s378_s12 }
 0x1ed   :  { %s380_s14 = sadd.f32 %s425_s10, %s379_s13 }
 0x1ef   :  { %382 = sst [smem:[#allocation2]] %s380_s14 }
 0x1f0   :  { %454 = shalt.err (!%p451_p2)
}
 0x1f1   :  { %s482_s22 = smov [#allocation2]  }
 0x1f2   :  { %390 = dma.smem_to_hbm %s482_s22, 16, %s562_s1, [#allocation3]  }
 0x1f3   :  { %455 = dma.done.wait [#allocation3], 16  }
 0x1f4   :  { %456 = vsyncadd [#allocation3], 4294967280 }
 0x1f5   :  { %394 = sfence }
 0x1f6   :  { %395 = vsyncpa [#allocation3], 1 }

// kernel: btwins_loss.2
= control target key start
LH: loop header
LB: loop body
LE: loop exit
PB: predicated region body
PF: predicated region fallthrough
CT: control target
= control target key end

     0   :  { %s1916_s15 = smov 0   ;;  %s2550_s0 = inlined_call_operand.vmem [shape: bf16[2,64,256], index: 0, kind: input, shape index: {}]   ;;  %s2551_s1 = inlined_call_operand.vmem [shape: bf16[256,256], index: 1, kind: input, shape index: {}]   ;;  %s2552_s2 = inlined_call_operand.vmem [shape: bf16[256,256], index: 2, kind: input, shape index: {}]   ;;  %s2553_s3 = inlined_call_operand.vmem [shape: bf16[256,256], index: 3, kind: input, shape index: {}]   ;;  %s2554_s4 = inlined_call_operand.vmem [shape: bf16[2,64,256], index: 4, kind: output, shape index: {}]  }
   0x1 LB: > { %s1542_s16 = sadd.s32 4294967295, %s1889_s15   ;;  %p1546_p0 = scmp.ge.s32.totalorder %s1889_s15, 1  ;;  %s1889_s15 = sphi %s1916_s15, %s14_s15  }
   0x2   : > { %p162_p1 = scmp.lt.s32.totalorder %s1889_s15, 3 }
   0x4   : > { %p163_p2 = pnand %p1546_p0, %p162_p1 }
   0x5   : > { %v1715_v0 = vld [vmem:[%s2551_s1 + $0x4] ss:$8 sps:$4 sm:$0xff] (!%p163_p2)   ;;  %v1717_v1 = vld [vmem:[%s2551_s1] ss:$8 sps:$4 sm:$0xff] (!%p163_p2)   ;;  %v1718_v2 = vld [vmem:[%s2551_s1 + $0x14] ss:$8 sps:$4 sm:$0xff] (!%p163_p2)  }
   0x6   : > { %166 = sbr.rel (%p163_p2) target bundleno = 908 (0x38c), region = 36  ;;  %438 = vmatprep.subr.bf16.mxu0 (!%p163_p2), %v1715_v0  ;;  %v1720_v3 = vld [vmem:[%s2551_s1 + $0x10] ss:$8 sps:$4 sm:$0xff] (!%p163_p2)   ;;  %v1721_v4 = vld [vmem:[%s2551_s1 + $0x24] ss:$8 sps:$4 sm:$0xff] (!%p163_p2)   ;;  %p188_p3 = scmp.lt.s32.totalorder (!%p163_p2), %s1542_s16, 1 }
   0x7   : > { %439 = vmatpush1.bf16.msra.mxu0 (!%p163_p2), %v1717_v1  ;;  %v1723_v5 = vld [vmem:[%s2551_s1 + $0x20] ss:$8 sps:$4 sm:$0xff] (!%p163_p2)   ;;  %v1724_v6 = vld [vmem:[%s2551_s1 + $0x34] ss:$8 sps:$4 sm:$0xff] (!%p163_p2)   ;;  %v1726_v7 = vld [vmem:[%s2551_s1 + $0x30] ss:$8 sps:$4 sm:$0xff] (!%p163_p2)  }
   0x8   : > { %440 = vmatprep.subr.bf16.mxu0 (!%p163_p2), %v1718_v2  ;;  %v1727_v8 = vld [vmem:[%s2551_s1 + $0x44] ss:$8 sps:$4 sm:$0xff] (!%p163_p2)   ;;  %v1729_v9 = vld [vmem:[%s2551_s1 + $0x40] ss:$8 sps:$4 sm:$0xff] (!%p163_p2)   ;;  %v1730_v10 = vld [vmem:[%s2551_s1 + $0x54] ss:$8 sps:$4 sm:$0xff] (!%p163_p2)  }
   0x9   : > { %v1732_v11 = vld [vmem:[%s2551_s1 + $0x50] ss:$8 sps:$4 sm:$0xff] (!%p163_p2)   ;;  %v1733_v12 = vld [vmem:[%s2551_s1 + $0x64] ss:$8 sps:$4 sm:$0xff] (!%p163_p2)   ;;  %v1735_v14 = vld [vmem:[%s2551_s1 + $0x60] ss:$8 sps:$4 sm:$0xff] (!%p163_p2)  }
   0xa   : > { %v1736_v15 = vld [vmem:[%s2551_s1 + $0x74] ss:$8 sps:$4 sm:$0xff] (!%p163_p2)   ;;  %v1738_v16 = vld [vmem:[%s2551_s1 + $0x70] ss:$8 sps:$4 sm:$0xff] (!%p163_p2)   ;;  %v1739_v17 = vld [vmem:[%s2551_s1 + $0x84] ss:$8 sps:$4 sm:$0xff] (!%p163_p2)  }
   0xb   : > { %441 = vmatpush1.bf16.msra.mxu0 (!%p163_p2), %v1720_v3  ;;  %v1741_v18 = vld [vmem:[%s2551_s1 + $0x80] ss:$8 sps:$4 sm:$0xff] (!%p163_p2)   ;;  %v1742_v19 = vld [vmem:[%s2551_s1 + $0x94] ss:$8 sps:$4 sm:$0xff] (!%p163_p2)   ;;  %v1744_v20 = vld [vmem:[%s2551_s1 + $0x90] ss:$8 sps:$4 sm:$0xff] (!%p163_p2)  }
   0xc   : > { %442 = vmatprep.subr.bf16.mxu0 (!%p163_p2), %v1721_v4  ;;  %v1745_v21 = vld [vmem:[%s2551_s1 + $0xa4] ss:$8 sps:$4 sm:$0xff] (!%p163_p2)   ;;  %v1747_v22 = vld [vmem:[%s2551_s1 + $0xa0] ss:$8 sps:$4 sm:$0xff] (!%p163_p2)   ;;  %v1748_v23 = vld [vmem:[%s2551_s1 + $0xb4] ss:$8 sps:$4 sm:$0xff] (!%p163_p2)  }
   0xd   : > { %s2556_s16 = smov (!%p188_p3, %s1542_s16), 1  ;;  %v1750_v24 = vld [vmem:[%s2551_s1 + $0xb0] ss:$8 sps:$4 sm:$0xff]   ;;  %v1751_v25 = vld [vmem:[%s2551_s1 + $0xc4] ss:$8 sps:$4 sm:$0xff]  }
   0xe   : > { %s1665_s13 = sshll.u32 %s2556_s16, 6  ;;  %v1753_v26 = vld [vmem:[%s2551_s1 + $0xc0] ss:$8 sps:$4 sm:$0xff]   ;;  %v1754_v27 = vld [vmem:[%s2551_s1 + $0xd4] ss:$8 sps:$4 sm:$0xff]  }
   0xf   : > { %443 = vmatpush1.bf16.msra.mxu0 %v1723_v5  ;;  %s1968_s20 = scalar_lea.vmem %s2550_s0, %s1665_s13  ;;  %v1756_v28 = vld [vmem:[%s2551_s1 + $0xd0] ss:$8 sps:$4 sm:$0xff]   ;;  %v1757_v29 = vld [vmem:[%s2551_s1 + $0xe4] ss:$8 sps:$4 sm:$0xff]   ;;  %v1759_v30 = vld [vmem:[%s2551_s1 + $0xe0] ss:$8 sps:$4 sm:$0xff]   ;;  %s197_s5 = scalar_lea.vmem %s2554_s4, %s1665_s13 }
  0x10   : > { %444 = vmatprep.subr.bf16.mxu0 %v1724_v6  ;;  %v1765_v13 = vld [vmem:[%s1968_s20 + $0x4] ss:$8 sps:$4 sm:$0xff]   ;;  %v1760_v31 = vld [vmem:[%s2551_s1 + $0xf4] ss:$8 sps:$4 sm:$0xff]   ;;  %v1762_v32 = vld [vmem:[%s2551_s1 + $0xf0] ss:$8 sps:$4 sm:$0xff]  }
  0x11   : > { %470 = vmatprep.mubr.bf16.mxu0 %v1765_v13  ;;  %v1763_v33 = vld [vmem:[%s1968_s20] ss:$8 sps:$4 sm:$0xff]   ;;  %v1766_v34 = vld [vmem:[%s1968_s20 + $0x14] ss:$8 sps:$4 sm:$0xff]   ;;  %v1768_v35 = vld [vmem:[%s1968_s20 + $0x10] ss:$8 sps:$4 sm:$0xff]  }
  0x12   : > { %v1769_v36 = vld [vmem:[%s1968_s20 + $0x24] ss:$8 sps:$4 sm:$0xff]   ;;  %v1771_v37 = vld [vmem:[%s1968_s20 + $0x20] ss:$8 sps:$4 sm:$0xff]   ;;  %v1772_v38 = vld [vmem:[%s1968_s20 + $0x34] ss:$8 sps:$4 sm:$0xff]  }
  0x13   : > { %445 = vmatpush1.bf16.msra.mxu0 %v1726_v7  ;;  %v1774_v39 = vld [vmem:[%s1968_s20 + $0x30] ss:$8 sps:$4 sm:$0xff]   ;;  %v1775_v40 = vld [vmem:[%s2552_s2 + $0x4] ss:$8 sps:$4 sm:$0xff]   ;;  %v1777_v41 = vld [vmem:[%s2552_s2] ss:$8 sps:$4 sm:$0xff]  }
  0x14   : > { %446 = vmatprep.subr.bf16.mxu0 %v1727_v8  ;;  %841 = vmatprep.subr.bf16.mxu1 %v1775_v40  ;;  %v1778_v42 = vld [vmem:[%s2552_s2 + $0x14] ss:$8 sps:$4 sm:$0xff]   ;;  %v1780_v43 = vld [vmem:[%s2552_s2 + $0x10] ss:$8 sps:$4 sm:$0xff]   ;;  %v1781_v44 = vld [vmem:[%s2552_s2 + $0x24] ss:$8 sps:$4 sm:$0xff]  }
  0x15   : > { %842 = vmatpush1.bf16.msra.mxu1 %v1777_v41  ;;  %v1783_v45 = vld [vmem:[%s2552_s2 + $0x20] ss:$8 sps:$4 sm:$0xff]   ;;  %v1784_v46 = vld [vmem:[%s2552_s2 + $0x34] ss:$8 sps:$4 sm:$0xff]   ;;  %v1786_v47 = vld [vmem:[%s2552_s2 + $0x30] ss:$8 sps:$4 sm:$0xff]  }
  0x16   : > { %843 = vmatprep.subr.bf16.mxu1 %v1778_v42  ;;  %v1787_v48 = vld [vmem:[%s2552_s2 + $0x44] ss:$8 sps:$4 sm:$0xff]   ;;  %v1789_v49 = vld [vmem:[%s2552_s2 + $0x40] ss:$8 sps:$4 sm:$0xff]   ;;  %v1790_v50 = vld [vmem:[%s2552_s2 + $0x54] ss:$8 sps:$4 sm:$0xff]  }
  0x17   : > { %447 = vmatpush1.bf16.msra.mxu0 %v1729_v9  ;;  %v1792_v51 = vld [vmem:[%s2552_s2 + $0x50] ss:$8 sps:$4 sm:$0xff]   ;;  %v1793_v52 = vld [vmem:[%s2552_s2 + $0x64] ss:$8 sps:$4 sm:$0xff]   ;;  %v1795_v53 = vld [vmem:[%s2552_s2 + $0x60] ss:$8 sps:$4 sm:$0xff]  }
  0x18   : > { %448 = vmatprep.subr.bf16.mxu0 %v1730_v10  ;;  %v1796_v54 = vld [vmem:[%s2552_s2 + $0x74] ss:$8 sps:$4 sm:$0xff]   ;;  %v1798_v55 = vld [vmem:[%s2552_s2 + $0x70] ss:$8 sps:$4 sm:$0xff]   ;;  %v1799_v56 = vld [vmem:[%s2552_s2 + $0x84] ss:$8 sps:$4 sm:$0xff]  }
  0x19   : > { %844 = vmatpush1.bf16.msra.mxu1 %v1780_v43  ;;  %v1801_v57 = vld [vmem:[%s2552_s2 + $0x80] ss:$8 sps:$4 sm:$0xff]   ;;  %v1802_v58 = vld [vmem:[%s2552_s2 + $0x94] ss:$8 sps:$4 sm:$0xff]   ;;  %v1804_v59 = vld [vmem:[%s2552_s2 + $0x90] ss:$8 sps:$4 sm:$0xff]  }
  0x1a   : > { %845 = vmatprep.subr.bf16.mxu1 %v1781_v44  ;;  %v1805_v60 = vld [vmem:[%s2552_s2 + $0xa4] ss:$8 sps:$4 sm:$0xff]   ;;  %v1807_v61 = vld [vmem:[%s2552_s2 + $0xa0] ss:$8 sps:$4 sm:$0xff]   ;;  %v1808_v62 = vld [vmem:[%s2552_s2 + $0xb4] ss:$8 sps:$4 sm:$0xff]  }
  0x1b   : > { %449 = vmatpush1.bf16.msra.mxu0 %v1732_v11  ;;  %v1810_v63 = vld [vmem:[%s2552_s2 + $0xb0] ss:$8 sps:$4 sm:$0xff]   ;;  %v1811_v0 = vld [vmem:[%s2552_s2 + $0xc4] ss:$8 sps:$4 sm:$0xff]   ;;  %v1813_v1 = vld [vmem:[%s2552_s2 + $0xc0] ss:$8 sps:$4 sm:$0xff]  }
  0x1c   : > { %450 = vmatprep.subr.bf16.mxu0 %v1733_v12  ;;  %v1814_v2 = vld [vmem:[%s2552_s2 + $0xd4] ss:$8 sps:$4 sm:$0xff]   ;;  %v1816_v3 = vld [vmem:[%s2552_s2 + $0xd0] ss:$8 sps:$4 sm:$0xff]   ;;  %v1817_v4 = vld [vmem:[%s2552_s2 + $0xe4] ss:$8 sps:$4 sm:$0xff]  }
  0x1d   : > { %846 = vmatpush1.bf16.msra.mxu1 %v1783_v45  ;;  %v1819_v5 = vld [vmem:[%s2552_s2 + $0xe0] ss:$8 sps:$4 sm:$0xff]   ;;  %v1820_v6 = vld [vmem:[%s2552_s2 + $0xf4] ss:$8 sps:$4 sm:$0xff]   ;;  %v1822_v7 = vld [vmem:[%s2552_s2 + $0xf0] ss:$8 sps:$4 sm:$0xff]  }
  0x1e   : > { %847 = vmatprep.subr.bf16.mxu1 %v1784_v46 }
  0x1f   : > { %451 = vmatpush1.bf16.msra.mxu0 %v1735_v14 }
  0x20   : > { %452 = vmatprep.subr.bf16.mxu0 %v1736_v15 }
  0x21   : > { %848 = vmatpush1.bf16.msra.mxu1 %v1786_v47 }
  0x22   : > { %849 = vmatprep.subr.bf16.mxu1 %v1787_v48 }
  0x23   : > { %453 = vmatpush1.bf16.msra.mxu0 %v1738_v16 }
  0x24   : > { %454 = vmatprep.subr.bf16.mxu0 %v1739_v17 }
  0x25   : > { %850 = vmatpush1.bf16.msra.mxu1 %v1789_v49 }
  0x26   : > { %851 = vmatprep.subr.bf16.mxu1 %v1790_v50 }
  0x27   : > { %455 = vmatpush1.bf16.msra.mxu0 %v1741_v18 }
  0x28   : > { %456 = vmatprep.subr.bf16.mxu0 %v1742_v19 }
  0x29   : > { %852 = vmatpush1.bf16.msra.mxu1 %v1792_v51 }
  0x2a   : > { %853 = vmatprep.subr.bf16.mxu1 %v1793_v52 }
  0x2b   : > { %457 = vmatpush1.bf16.msra.mxu0 %v1744_v20 }
  0x2c   : > { %458 = vmatprep.subr.bf16.mxu0 %v1745_v21 }
  0x2d   : > { %854 = vmatpush1.bf16.msra.mxu1 %v1795_v53 }
  0x2e   : > { %855 = vmatprep.subr.bf16.mxu1 %v1796_v54 }
  0x2f   : > { %459 = vmatpush1.bf16.msra.mxu0 %v1747_v22 }
  0x30   : > { %460 = vmatprep.subr.bf16.mxu0 %v1748_v23 }
  0x31   : > { %856 = vmatpush1.bf16.msra.mxu1 %v1798_v55 }
  0x32   : > { %857 = vmatprep.subr.bf16.mxu1 %v1799_v56 }
  0x33   : > { %461 = vmatpush1.bf16.msra.mxu0 %v1750_v24 }
  0x34   : > { %462 = vmatprep.subr.bf16.mxu0 %v1751_v25 }
  0x35   : > { %858 = vmatpush1.bf16.msra.mxu1 %v1801_v57 }
  0x36   : > { %859 = vmatprep.subr.bf16.mxu1 %v1802_v58 }
  0x37   : > { %463 = vmatpush1.bf16.msra.mxu0 %v1753_v26 }
  0x38   : > { %464 = vmatprep.subr.bf16.mxu0 %v1754_v27 }
  0x39   : > { %860 = vmatpush1.bf16.msra.mxu1 %v1804_v59 }
  0x3a   : > { %861 = vmatprep.subr.bf16.mxu1 %v1805_v60 }
  0x3b   : > { %465 = vmatpush1.bf16.msra.mxu0 %v1756_v28 }
  0x3c   : > { %466 = vmatprep.subr.bf16.mxu0 %v1757_v29 }
  0x3d   : > { %862 = vmatpush1.bf16.msra.mxu1 %v1807_v61 }
  0x3e   : > { %863 = vmatprep.subr.bf16.mxu1 %v1808_v62 }
  0x3f   : > { %467 = vmatpush1.bf16.msra.mxu0 %v1759_v30 }
  0x40   : > { %468 = vmatprep.subr.bf16.mxu0 %v1760_v31 }
  0x41   : > { %864 = vmatpush1.bf16.msra.mxu1 %v1810_v63 }
  0x42   : > { %865 = vmatprep.subr.bf16.mxu1 %v1811_v0 }
  0x43   : > { %469 = vmatpush1.bf16.msra.mxu0 %v1762_v32 }
  0x45   : > { %866 = vmatpush1.bf16.msra.mxu1 %v1813_v1 }
  0x46   : > { %471 = vmatmul.mubr.bf16.vlgmr.msra.gmra.mrb[0].mxu0 %v1763_v33  ;;  %867 = vmatprep.subr.bf16.mxu1 %v1814_v2 }
  0x47   : > { %480 = vmatprep.mubr.bf16.mxu0 %v1766_v34 }
  0x49   : > { %868 = vmatpush1.bf16.msra.mxu1 %v1816_v3 }
  0x4a   : > { %869 = vmatprep.subr.bf16.mxu1 %v1817_v4 }
  0x4d   : > { %870 = vmatpush1.bf16.msra.mxu1 %v1819_v5 }
  0x4e   : > { %481 = vmatmul.mubr.bf16.gmra.mrb[4].mxu0 %v1768_v35  ;;  %871 = vmatprep.subr.bf16.mxu1 %v1820_v6 }
  0x4f   : > { %490 = vmatprep.mubr.bf16.mxu0 %v1769_v36 }
  0x51   : > { %872 = vmatpush1.bf16.msra.mxu1 %v1822_v7 }
  0x56   : > { %491 = vmatmul.mubr.bf16.gmra.mrb[8].mxu0 %v1771_v37 }
  0x57   : > { %500 = vmatprep.mubr.bf16.mxu0 %v1772_v38 }
  0x5e   : > { %501 = vmatmul.mubr.bf16.gmra.mrb[12].mxu0 %v1774_v39 }
 0x119   : > { %v2134_v8 = vpop.f32.mrb[0].mxu0 }
 0x11a   : > { %v2136_v9 = vpop.f32.mrb[1].mxu0  ;;  %v537_v11 = vmul.f32 %v2134_v8, %v2134_v8 }
 0x11b   : > { %v2138_v10 = vpop.f32.mrb[2].mxu0  ;;  %v538_v15 = vmul.f32 %v2136_v9, %v2136_v9 }
 0x11c   : > { %v511_v12 = vadd.f32 %v2138_v10, %v2134_v8  ;;  %v539_v13 = vmul.f32 %v2138_v10, %v2138_v10  ;;  %v2146_v14 = vpop.f32.mrb[3].mxu0 }
 0x11d   : > { %v524_v16 = vadd.f32 %v2146_v14, %v2136_v9  ;;  %v540_v17 = vmul.f32 %v2146_v14, %v2146_v14 }
 0x11e   : > { %v553_v18 = vadd.f32 %v539_v13, %v537_v11 }
 0x11f   : > { %v566_v19 = vadd.f32 %v540_v17, %v538_v15 }
 0x121   : > { %v2154_v20 = vpop.f32.mrb[4].mxu0 }
 0x122   : > { %v512_v21 = vadd.f32 %v511_v12, %v2154_v20  ;;  %v541_v22 = vmul.f32 %v2154_v20, %v2154_v20  ;;  %v2159_v23 = vpop.f32.mrb[5].mxu0 }
 0x123   : > { %v525_v24 = vadd.f32 %v524_v16, %v2159_v23  ;;  %v542_v25 = vmul.f32 %v2159_v23, %v2159_v23  ;;  %v2164_v26 = vpop.f32.mrb[6].mxu0 }
 0x124   : > { %v554_v27 = vadd.f32 %v553_v18, %v541_v22  ;;  %v513_v28 = vadd.f32 %v512_v21, %v2164_v26  ;;  %v543_v29 = vmul.f32 %v2164_v26, %v2164_v26  ;;  %v2169_v30 = vpop.f32.mrb[7].mxu0 }
 0x125   : > { %v567_v31 = vadd.f32 %v566_v19, %v542_v25  ;;  %v526_v32 = vadd.f32 %v525_v24, %v2169_v30  ;;  %v544_v33 = vmul.f32 %v2169_v30, %v2169_v30 }
 0x126   : > { %v555_v34 = vadd.f32 %v554_v27, %v543_v29 }
 0x127   : > { %v568_v35 = vadd.f32 %v567_v31, %v544_v33 }
 0x129   : > { %v2174_v36 = vpop.f32.mrb[8].mxu0 }
 0x12a   : > { %v514_v37 = vadd.f32 %v513_v28, %v2174_v36  ;;  %v545_v38 = vmul.f32 %v2174_v36, %v2174_v36  ;;  %v2179_v39 = vpop.f32.mrb[9].mxu0 }
 0x12b   : > { %v527_v40 = vadd.f32 %v526_v32, %v2179_v39  ;;  %v546_v41 = vmul.f32 %v2179_v39, %v2179_v39  ;;  %v2184_v42 = vpop.f32.mrb[10].mxu0 }
 0x12c   : > { %v556_v43 = vadd.f32 %v555_v34, %v545_v38  ;;  %v515_v44 = vadd.f32 %v514_v37, %v2184_v42  ;;  %v547_v45 = vmul.f32 %v2184_v42, %v2184_v42  ;;  %v2189_v46 = vpop.f32.mrb[11].mxu0 }
 0x12d   : > { %v569_v47 = vadd.f32 %v568_v35, %v546_v41  ;;  %v528_v48 = vadd.f32 %v527_v40, %v2189_v46  ;;  %v548_v49 = vmul.f32 %v2189_v46, %v2189_v46 }
 0x12e   : > { %v557_v50 = vadd.f32 %v556_v43, %v547_v45 }
 0x12f   : > { %v570_v51 = vadd.f32 %v569_v47, %v548_v49 }
 0x131   : > { %v2194_v52 = vpop.f32.mrb[12].mxu0 }
 0x132   : > { %v516_v53 = vadd.f32 %v515_v44, %v2194_v52  ;;  %v549_v54 = vmul.f32 %v2194_v52, %v2194_v52  ;;  %v2199_v55 = vpop.f32.mrb[13].mxu0 }
 0x133   : > { %v529_v56 = vadd.f32 %v528_v48, %v2199_v55  ;;  %v550_v57 = vmul.f32 %v2199_v55, %v2199_v55  ;;  %v2204_v58 = vpop.f32.mrb[14].mxu0 }
 0x134   : > { %v558_v59 = vadd.f32 %v557_v50, %v549_v54  ;;  %v517_v60 = vadd.f32 %v516_v53, %v2204_v58  ;;  %v551_v61 = vmul.f32 %v2204_v58, %v2204_v58  ;;  %v2209_v62 = vpop.f32.mrb[15].mxu0 }
 0x135   : > { %v571_v63 = vadd.f32 %v570_v51, %v550_v57  ;;  %v530_v0 = vadd.f32 %v529_v56, %v2209_v62  ;;  %v552_v1 = vmul.f32 %v2209_v62, %v2209_v62 }
 0x136   : > { %v518_v2 = vrot.slane %v517_v60, 4  ;;  %v559_v3 = vadd.f32 %v558_v59, %v551_v61 }
 0x137   : > { %v531_v4 = vrot.slane %v530_v0, 4  ;;  %v572_v5 = vadd.f32 %v571_v63, %v552_v1 }
 0x138   : > { %v519_v6 = vadd.f32 %v518_v2, %v517_v60  ;;  %v560_v7 = vrot.slane %v559_v3, 4 }
 0x139   : > { %v532_v11 = vadd.f32 %v531_v4, %v530_v0  ;;  %v573_v12 = vrot.slane %v572_v5, 4 }
 0x13a   : > { %v520_v13 = vrot.slane %v519_v6, 2  ;;  %v561_v15 = vadd.f32 %v560_v7, %v559_v3 }
 0x13b   : > { %v533_v16 = vrot.slane %v532_v11, 2  ;;  %v574_v17 = vadd.f32 %v573_v12, %v572_v5 }
 0x13c   : > { %v521_v18 = vadd.f32 %v520_v13, %v519_v6  ;;  %v562_v19 = vrot.slane %v561_v15, 2 }
 0x13d   : > { %v534_v21 = vadd.f32 %v533_v16, %v532_v11  ;;  %v575_v22 = vrot.slane %v574_v17, 2 }
 0x13e   : > { %v522_v24 = vrot.slane %v521_v18, 1  ;;  %v563_v25 = vadd.f32 %v562_v19, %v561_v15 }
 0x13f   : > { %v535_v27 = vrot.slane %v534_v21, 1  ;;  %v576_v28 = vadd.f32 %v575_v22, %v574_v17 }
 0x140   : > { %v523_v29 = vadd.f32 %v522_v24, %v521_v18  ;;  %v564_v31 = vrot.slane %v563_v25, 1 }
 0x141   : > { %v536_v32 = vadd.f32 %v535_v27, %v534_v21  ;;  %v577_v33 = vrot.slane %v576_v28, 1 }
 0x142   : > { %v565_v34 = vadd.f32 %v564_v31, %v563_v25  ;;  %v2214_v35 = vmul.f32 0.015625, %v523_v29 }
 0x143   : > { %v578_v37 = vadd.f32 %v577_v33, %v576_v28  ;;  %v580_v38 = vmul.f32 0.015625, %v536_v32 }
 0x144   : > { %v581_v40 = vmul.f32 0.015625, %v565_v34  ;;  %v583_v41 = vmul.f32 %v2214_v35, %v2214_v35  ;;  %v603_v43 = vsub.f32 %v2204_v58, %v2214_v35  ;;  %v589_v44 = vsub.f32 %v2134_v8, %v2214_v35 }
 0x145   : > { %v582_v45 = vmul.f32 0.015625, %v578_v37  ;;  %v584_v47 = vmul.f32 %v580_v38, %v580_v38  ;;  %v604_v48 = vsub.f32 %v2209_v62, %v580_v38  ;;  %v590_v49 = vsub.f32 %v2136_v9, %v580_v38 }
 0x146   : > { %v585_v50 = vsub.f32 %v581_v40, %v583_v41  ;;  %v592_v51 = vsub.f32 %v2146_v14, %v580_v38  ;;  %v591_v53 = vsub.f32 %v2138_v10, %v2214_v35  ;;  %v594_v54 = vsub.f32 %v2159_v23, %v580_v38 }
 0x147   : > { %v586_v56 = vsub.f32 %v582_v45, %v584_v47  ;;  %v596_v57 = vsub.f32 %v2169_v30, %v580_v38  ;;  %v593_v8 = vsub.f32 %v2154_v20, %v2214_v35  ;;  %v595_v58 = vsub.f32 %v2164_v26, %v2214_v35  ;;  %v1823_v45 = vld [vmem:[%s2553_s3] ss:$8 sps:$4 sm:$0xff]   ;;  %v1825_v47 = vld [vmem:[%s2553_s3 + $0x4] ss:$8 sps:$4 sm:$0xff]  }
 0x148   : > { %v587_v59 = vmax.f32 %v585_v50, 0.0  ;;  %v598_v9 = vsub.f32 %v2179_v39, %v580_v38  ;;  %v600_v60 = vsub.f32 %v2189_v46, %v580_v38  ;;  %v597_v14 = vsub.f32 %v2174_v36, %v2214_v35  ;;  %1244 = vmatprep.subr.bf16.mxu0 %v1825_v47  ;;  %1675 = vmatprep.subr.bf16.mxu1 %v1825_v47  ;;  %v1831_v50 = vld [vmem:[%s2553_s3 + $0x24] ss:$8 sps:$4 sm:$0xff]  }
 0x149   : > { %v588_v10 = vmax.f32 %v586_v56, 0.0  ;;  %v599_v23 = vsub.f32 %v2184_v42, %v2214_v35  ;;  %v602_v30 = vsub.f32 %v2199_v55, %v580_v38  ;;  %v601_v20 = vsub.f32 %v2194_v52, %v2214_v35  ;;  %1245 = vmatpush1.bf16.msra.mxu0 %v1823_v45  ;;  %v1837_v56 = vld [vmem:[%s2553_s3 + $0x44] ss:$8 sps:$4 sm:$0xff]  }
 0x14a   : > { %v605_v61 = vadd.f32 1e-05, %v587_v59  ;;  %v1843_v59 = vld [vmem:[%s2553_s3 + $0x64] ss:$8 sps:$4 sm:$0xff]  }
 0x14b   : > { %v606_v62 = vadd.f32 1e-05, %v588_v10  ;;  %v1849_v10 = vld [vmem:[%s2553_s3 + $0x84] ss:$8 sps:$4 sm:$0xff]  }
 0x14c   : > { %1871 = vrsqrt.f32 %v605_v61  ;;  %v1855_v61 = vld [vmem:[%s2553_s3 + $0xa4] ss:$8 sps:$4 sm:$0xff]  }
 0x14d   : > { %1873 = vrsqrt.f32 %v606_v62  ;;  %v1853_v62 = vld [vmem:[%s2553_s3 + $0xa0] ss:$8 sps:$4 sm:$0xff]  }
 0x156   : > { %v1872_v26 = vpop.eup %1871 }
 0x157   : > { %v1874_v39 = vpop.eup %1873  ;;  %v623_v63 = vmul.f32 %v1872_v26, %v603_v43  ;;  %v609_v46 = vmul.f32 %v1872_v26, %v589_v44  ;;  %v611_v0 = vmul.f32 %v1872_v26, %v591_v53  ;;  %v613_v1 = vmul.f32 %v1872_v26, %v593_v8  ;;  %v1832_v53 = vld [vmem:[%s2553_s3 + $0x30] ss:$8 sps:$4 sm:$0xff]   ;;  %v1840_v8 = vld [vmem:[%s2553_s3 + $0x54] ss:$8 sps:$4 sm:$0xff]  }
 0x158   : > { %v624_v36 = vmul.f32 %v1874_v39, %v604_v48  ;;  %v610_v2 = vmul.f32 %v1874_v39, %v590_v49  ;;  %v612_v3 = vmul.f32 %v1874_v39, %v592_v51  ;;  %v614_v4 = vmul.f32 %v1874_v39, %v594_v54  ;;  %v1826_v48 = vld [vmem:[%s2553_s3 + $0x10] ss:$8 sps:$4 sm:$0xff]   ;;  %v1828_v49 = vld [vmem:[%s2553_s3 + $0x14] ss:$8 sps:$4 sm:$0xff]   ;;  %v1829_v51 = vld [vmem:[%s2553_s3 + $0x20] ss:$8 sps:$4 sm:$0xff]  }
 0x159   : > { %v625_v42 = vmax.f32 %v609_v46, 0.0  ;;  %v627_v5 = vmax.f32 %v611_v0, 0.0  ;;  %v616_v55 = vmul.f32 %v1874_v39, %v596_v57  ;;  %v615_v6 = vmul.f32 %v1872_v26, %v595_v58  ;;  %1246 = vmatprep.subr.bf16.mxu0 %v1828_v49  ;;  %v1834_v54 = vld [vmem:[%s2553_s3 + $0x34] ss:$8 sps:$4 sm:$0xff]   ;;  %v1835_v57 = vld [vmem:[%s2553_s3 + $0x40] ss:$8 sps:$4 sm:$0xff]  }
 0x15a   : > { %v626_v7 = vmax.f32 %v610_v2, 0.0  ;;  %v628_v52 = vmax.f32 %v612_v3, 0.0  ;;  %v630_v11 = vmax.f32 %v614_v4, 0.0  ;;  %v629_v12 = vmax.f32 %v613_v1, 0.0  ;;  %1247 = vmatpush1.bf16.msra.mxu0 %v1826_v48  ;;  %v1838_v58 = vld [vmem:[%s2553_s3 + $0x50] ss:$8 sps:$4 sm:$0xff]  }
 0x15b   : > { %v641_v13 = vpack.c.bf16 %v627_v5, %v625_v42  ;;  %v632_v15 = vmax.f32 %v616_v55, 0.0  ;;  %v631_v16 = vmax.f32 %v615_v6, 0.0  ;;  %v618_v17 = vmul.f32 %v1874_v39, %v598_v9  ;;  %1248 = vmatprep.subr.bf16.mxu0 %v1831_v50  ;;  %v1841_v9 = vld [vmem:[%s2553_s3 + $0x60] ss:$8 sps:$4 sm:$0xff]   ;;  %v1862_v0 = vld [vmem:[%s2553_s3 + $0xd0] ss:$8 sps:$4 sm:$0xff]  }
 0x15c   : > { %v642_v18 = vpack.c.bf16 %v628_v52, %v626_v7  ;;  %v620_v19 = vmul.f32 %v1874_v39, %v600_v60  ;;  %v617_v21 = vmul.f32 %v1872_v26, %v597_v14  ;;  %v619_v22 = vmul.f32 %v1872_v26, %v599_v23  ;;  %v1846_v60 = vld [vmem:[%s2553_s3 + $0x74] ss:$8 sps:$4 sm:$0xff]   ;;  %v1844_v14 = vld [vmem:[%s2553_s3 + $0x70] ss:$8 sps:$4 sm:$0xff]   ;;  %v1847_v23 = vld [vmem:[%s2553_s3 + $0x80] ss:$8 sps:$4 sm:$0xff]  }
 0x15d   : > { %v644_v24 = vpack.c.bf16 %v632_v15, %v630_v11  ;;  %v643_v25 = vpack.c.bf16 %v631_v16, %v629_v12  ;;  %v634_v27 = vmax.f32 %v618_v17, 0.0  ;;  %v622_v28 = vmul.f32 %v1874_v39, %v602_v30  ;;  %v1852_v30 = vld [vmem:[%s2553_s3 + $0x94] ss:$8 sps:$4 sm:$0xff]   ;;  %v1856_v39 = vld [vmem:[%s2553_s3 + $0xb0] ss:$8 sps:$4 sm:$0xff]  }
 0x15e   : > { %873 = vmatprep.mubr.bf16.mxu1 %v642_v18  ;;  %v636_v29 = vmax.f32 %v620_v19, 0.0  ;;  %v633_v31 = vmax.f32 %v617_v21, 0.0  ;;  %v635_v32 = vmax.f32 %v619_v22, 0.0  ;;  %v640_v33 = vmax.f32 %v624_v36, 0.0  ;;  %1249 = vmatpush1.bf16.msra.mxu0 %v1829_v51  ;;  %v1859_v46 = vld [vmem:[%s2553_s3 + $0xc0] ss:$8 sps:$4 sm:$0xff]  }
 0x15f   : > { %874 = vmatmul.mubr.bf16.vlgmr.msra.gmra.mrb[0].mxu1 %v641_v13  ;;  %v638_v34 = vmax.f32 %v622_v28, 0.0  ;;  %v621_v35 = vmul.f32 %v1872_v26, %v601_v20  ;;  %v639_v37 = vmax.f32 %v623_v63, 0.0  ;;  %1250 = vmatprep.subr.bf16.mxu0 %v1834_v54  ;;  %v1850_v20 = vld [vmem:[%s2553_s3 + $0x90] ss:$8 sps:$4 sm:$0xff]   ;;  %v1858_v26 = vld [vmem:[%s2553_s3 + $0xb4] ss:$8 sps:$4 sm:$0xff]  }
 0x160   : > { %883 = vmatprep.mubr.bf16.mxu1 %v644_v24  ;;  %v646_v38 = vpack.c.bf16 %v636_v29, %v634_v27  ;;  %v645_v40 = vpack.c.bf16 %v635_v32, %v633_v31  ;;  %1691 = vmatpush1.bf16.msra.mxu1 %v1823_v45  ;;  %v1861_v63 = vld [vmem:[%s2553_s3 + $0xc4] ss:$8 sps:$4 sm:$0xff]   ;;  %v1864_v1 = vld [vmem:[%s2553_s3 + $0xd4] ss:$8 sps:$4 sm:$0xff]   ;;  %v1865_v2 = vld [vmem:[%s2553_s3 + $0xe0] ss:$8 sps:$4 sm:$0xff]  }
 0x161   : > { %v648_v41 = vpack.c.bf16 %v640_v33, %v638_v34  ;;  %v637_v43 = vmax.f32 %v621_v35, 0.0  ;;  %1676 = vmatprep.subr.bf16.mxu1 %v1828_v49  ;;  %v1867_v36 = vld [vmem:[%s2553_s3 + $0xe4] ss:$8 sps:$4 sm:$0xff]   ;;  %v1870_v3 = vld [vmem:[%s2553_s3 + $0xf4] ss:$8 sps:$4 sm:$0xff]  }
 0x162   : > { %1251 = vmatpush1.bf16.msra.mxu0 %v1832_v53  ;;  %v1868_v4 = vld [vmem:[%s2553_s3 + $0xf0] ss:$8 sps:$4 sm:$0xff]  }
 0x163   : > { %v647_v44 = vpack.c.bf16 %v639_v37, %v637_v43  ;;  %1252 = vmatprep.subr.bf16.mxu0 %v1837_v56 }
 0x164   : > { %1692 = vmatpush1.bf16.msra.mxu1 %v1826_v48 }
 0x165   : > { %1677 = vmatprep.subr.bf16.mxu1 %v1831_v50 }
 0x166   : > { %1253 = vmatpush1.bf16.msra.mxu0 %v1835_v57 }
 0x167   : > { %884 = vmatmul.mubr.bf16.gmra.mrb[4].mxu1 %v643_v25  ;;  %1254 = vmatprep.subr.bf16.mxu0 %v1840_v8 }
 0x168   : > { %893 = vmatprep.mubr.bf16.mxu1 %v646_v38  ;;  %1693 = vmatpush1.bf16.msra.mxu1 %v1829_v51 }
 0x169   : > { %1678 = vmatprep.subr.bf16.mxu1 %v1834_v54 }
 0x16a   : > { %1255 = vmatpush1.bf16.msra.mxu0 %v1838_v58 }
 0x16b   : > { %1256 = vmatprep.subr.bf16.mxu0 %v1843_v59 }
 0x16c   : > { %1694 = vmatpush1.bf16.msra.mxu1 %v1832_v53 }
 0x16d   : > { %1679 = vmatprep.subr.bf16.mxu1 %v1837_v56 }
 0x16e   : > { %1257 = vmatpush1.bf16.msra.mxu0 %v1841_v9 }
 0x16f   : > { %894 = vmatmul.mubr.bf16.gmra.mrb[8].mxu1 %v645_v40  ;;  %1258 = vmatprep.subr.bf16.mxu0 %v1846_v60 }
 0x170   : > { %903 = vmatprep.mubr.bf16.mxu1 %v648_v41  ;;  %1695 = vmatpush1.bf16.msra.mxu1 %v1835_v57 }
 0x171   : > { %1680 = vmatprep.subr.bf16.mxu1 %v1840_v8 }
 0x172   : > { %1259 = vmatpush1.bf16.msra.mxu0 %v1844_v14 }
 0x173   : > { %1260 = vmatprep.subr.bf16.mxu0 %v1849_v10 }
 0x174   : > { %1696 = vmatpush1.bf16.msra.mxu1 %v1838_v58 }
 0x175   : > { %1681 = vmatprep.subr.bf16.mxu1 %v1843_v59 }
 0x176   : > { %1261 = vmatpush1.bf16.msra.mxu0 %v1847_v23 }
 0x177   : > { %904 = vmatmul.mubr.bf16.gmra.mrb[12].mxu1 %v647_v44  ;;  %1262 = vmatprep.subr.bf16.mxu0 %v1852_v30 }
 0x178   : > { %1697 = vmatpush1.bf16.msra.mxu1 %v1841_v9 }
 0x179   : > { %1682 = vmatprep.subr.bf16.mxu1 %v1846_v60 }
 0x17a   : > { %1263 = vmatpush1.bf16.msra.mxu0 %v1850_v20 }
 0x17b   : > { %1264 = vmatprep.subr.bf16.mxu0 %v1855_v61 }
 0x17c   : > { %1698 = vmatpush1.bf16.msra.mxu1 %v1844_v14 }
 0x17d   : > { %1683 = vmatprep.subr.bf16.mxu1 %v1849_v10 }
 0x17e   : > { %1265 = vmatpush1.bf16.msra.mxu0 %v1853_v62 }
 0x17f   : > { %1266 = vmatprep.subr.bf16.mxu0 %v1858_v26 }
 0x180   : > { %1699 = vmatpush1.bf16.msra.mxu1 %v1847_v23 }
 0x181   : > { %1684 = vmatprep.subr.bf16.mxu1 %v1852_v30 }
 0x182   : > { %1267 = vmatpush1.bf16.msra.mxu0 %v1856_v39 }
 0x183   : > { %1268 = vmatprep.subr.bf16.mxu0 %v1861_v63 }
 0x184   : > { %1700 = vmatpush1.bf16.msra.mxu1 %v1850_v20 }
 0x185   : > { %1685 = vmatprep.subr.bf16.mxu1 %v1855_v61 }
 0x186   : > { %1269 = vmatpush1.bf16.msra.mxu0 %v1859_v46 }
 0x187   : > { %1270 = vmatprep.subr.bf16.mxu0 %v1864_v1 }
 0x188   : > { %1701 = vmatpush1.bf16.msra.mxu1 %v1853_v62 }
 0x189   : > { %1686 = vmatprep.subr.bf16.mxu1 %v1858_v26 }
 0x18a   : > { %1271 = vmatpush1.bf16.msra.mxu0 %v1862_v0 }
 0x18b   : > { %1272 = vmatprep.subr.bf16.mxu0 %v1867_v36 }
 0x18c   : > { %1702 = vmatpush1.bf16.msra.mxu1 %v1856_v39 }
 0x18d   : > { %1687 = vmatprep.subr.bf16.mxu1 %v1861_v63 }
 0x18e   : > { %1273 = vmatpush1.bf16.msra.mxu0 %v1865_v2 }
 0x18f   : > { %1274 = vmatprep.subr.bf16.mxu0 %v1870_v3 }
 0x190   : > { %1703 = vmatpush1.bf16.msra.mxu1 %v1859_v46 }
 0x191   : > { %1688 = vmatprep.subr.bf16.mxu1 %v1864_v1 }
 0x192   : > { %1275 = vmatpush1.bf16.msra.mxu0 %v1868_v4 }
 0x194   : > { %1704 = vmatpush1.bf16.msra.mxu1 %v1862_v0 }
 0x195   : > { %1689 = vmatprep.subr.bf16.mxu1 %v1867_v36 }
 0x198   : > { %1705 = vmatpush1.bf16.msra.mxu1 %v1865_v2 }
 0x199   : > { %1690 = vmatprep.subr.bf16.mxu1 %v1870_v3 }
 0x19c   : > { %1706 = vmatpush1.bf16.msra.mxu1 %v1868_v4 }
 0x232   : > { %v2338_v42 = vpop.f32.mrb[0].mxu1 }
 0x233   : > { %v2340_v5 = vpop.f32.mrb[1].mxu1  ;;  %v940_v6 = vmul.f32 %v2338_v42, %v2338_v42 }
 0x234   : > { %v2342_v55 = vpop.f32.mrb[2].mxu1  ;;  %v941_v12 = vmul.f32 %v2340_v5, %v2340_v5 }
 0x235   : > { %v914_v7 = vadd.f32 %v2342_v55, %v2338_v42  ;;  %v942_v52 = vmul.f32 %v2342_v55, %v2342_v55  ;;  %v2350_v11 = vpop.f32.mrb[3].mxu1 }
 0x236   : > { %v927_v13 = vadd.f32 %v2350_v11, %v2340_v5  ;;  %v943_v15 = vmul.f32 %v2350_v11, %v2350_v11 }
 0x237   : > { %v956_v16 = vadd.f32 %v942_v52, %v940_v6 }
 0x238   : > { %v969_v17 = vadd.f32 %v943_v15, %v941_v12 }
 0x23a   : > { %v2358_v18 = vpop.f32.mrb[4].mxu1 }
 0x23b   : > { %v915_v19 = vadd.f32 %v914_v7, %v2358_v18  ;;  %v944_v21 = vmul.f32 %v2358_v18, %v2358_v18  ;;  %v2363_v22 = vpop.f32.mrb[5].mxu1 }
 0x23c   : > { %v928_v24 = vadd.f32 %v927_v13, %v2363_v22  ;;  %v945_v25 = vmul.f32 %v2363_v22, %v2363_v22  ;;  %v2368_v27 = vpop.f32.mrb[6].mxu1 }
 0x23d   : > { %v957_v28 = vadd.f32 %v956_v16, %v944_v21  ;;  %v916_v29 = vadd.f32 %v915_v19, %v2368_v27  ;;  %v946_v31 = vmul.f32 %v2368_v27, %v2368_v27  ;;  %v2373_v32 = vpop.f32.mrb[7].mxu1 }
 0x23e   : > { %v970_v33 = vadd.f32 %v969_v17, %v945_v25  ;;  %v929_v34 = vadd.f32 %v928_v24, %v2373_v32  ;;  %v947_v35 = vmul.f32 %v2373_v32, %v2373_v32 }
 0x23f   : > { %v958_v37 = vadd.f32 %v957_v28, %v946_v31 }
 0x240   : > { %v971_v38 = vadd.f32 %v970_v33, %v947_v35 }
 0x242   : > { %v2378_v40 = vpop.f32.mrb[8].mxu1 }
 0x243   : > { %v917_v41 = vadd.f32 %v916_v29, %v2378_v40  ;;  %v948_v43 = vmul.f32 %v2378_v40, %v2378_v40  ;;  %v2383_v44 = vpop.f32.mrb[9].mxu1 }
 0x244   : > { %v930_v45 = vadd.f32 %v929_v34, %v2383_v44  ;;  %v949_v47 = vmul.f32 %v2383_v44, %v2383_v44  ;;  %v2388_v48 = vpop.f32.mrb[10].mxu1 }
 0x245   : > { %v959_v49 = vadd.f32 %v958_v37, %v948_v43  ;;  %v918_v50 = vadd.f32 %v917_v41, %v2388_v48  ;;  %v950_v51 = vmul.f32 %v2388_v48, %v2388_v48  ;;  %v2393_v53 = vpop.f32.mrb[11].mxu1 }
 0x246   : > { %v972_v54 = vadd.f32 %v971_v38, %v949_v47  ;;  %v931_v56 = vadd.f32 %v930_v45, %v2393_v53  ;;  %v951_v57 = vmul.f32 %v2393_v53, %v2393_v53 }
 0x247   : > { %v960_v8 = vadd.f32 %v959_v49, %v950_v51 }
 0x248   : > { %v973_v58 = vadd.f32 %v972_v54, %v951_v57 }
 0x24a   : > { %v2398_v59 = vpop.f32.mrb[12].mxu1 }
 0x24b   : > { %v919_v9 = vadd.f32 %v918_v50, %v2398_v59  ;;  %v952_v60 = vmul.f32 %v2398_v59, %v2398_v59  ;;  %v2403_v14 = vpop.f32.mrb[13].mxu1 }
 0x24c   : > { %v932_v10 = vadd.f32 %v931_v56, %v2403_v14  ;;  %v953_v23 = vmul.f32 %v2403_v14, %v2403_v14  ;;  %v2408_v30 = vpop.f32.mrb[14].mxu1 }
 0x24d   : > { %v961_v20 = vadd.f32 %v960_v8, %v952_v60  ;;  %v920_v61 = vadd.f32 %v919_v9, %v2408_v30  ;;  %v954_v62 = vmul.f32 %v2408_v30, %v2408_v30  ;;  %v2413_v26 = vpop.f32.mrb[15].mxu1 }
 0x24e   : > { %v974_v39 = vadd.f32 %v973_v58, %v953_v23  ;;  %v933_v63 = vadd.f32 %v932_v10, %v2413_v26  ;;  %v955_v46 = vmul.f32 %v2413_v26, %v2413_v26 }
 0x24f   : > { %v921_v0 = vrot.slane %v920_v61, 4  ;;  %v962_v1 = vadd.f32 %v961_v20, %v954_v62 }
 0x250   : > { %v934_v36 = vrot.slane %v933_v63, 4  ;;  %v975_v2 = vadd.f32 %v974_v39, %v955_v46 }
 0x251   : > { %v922_v3 = vadd.f32 %v921_v0, %v920_v61  ;;  %v963_v4 = vrot.slane %v962_v1, 4 }
 0x252   : > { %v935_v6 = vadd.f32 %v934_v36, %v933_v63  ;;  %v976_v7 = vrot.slane %v975_v2, 4 }
 0x253   : > { %v923_v52 = vrot.slane %v922_v3, 2  ;;  %v964_v12 = vadd.f32 %v963_v4, %v962_v1 }
 0x254   : > { %v936_v13 = vrot.slane %v935_v6, 2  ;;  %v977_v15 = vadd.f32 %v976_v7, %v975_v2 }
 0x255   : > { %v924_v16 = vadd.f32 %v923_v52, %v922_v3  ;;  %v965_v17 = vrot.slane %v964_v12, 2 }
 0x256   : > { %v937_v19 = vadd.f32 %v936_v13, %v935_v6  ;;  %v978_v21 = vrot.slane %v977_v15, 2 }
 0x257   : > { %v925_v24 = vrot.slane %v924_v16, 1  ;;  %v966_v25 = vadd.f32 %v965_v17, %v964_v12 }
 0x258   : > { %v938_v28 = vrot.slane %v937_v19, 1  ;;  %v979_v29 = vadd.f32 %v978_v21, %v977_v15 }
 0x259   : > { %v926_v31 = vadd.f32 %v925_v24, %v924_v16  ;;  %v967_v33 = vrot.slane %v966_v25, 1 }
 0x25a   : > { %v939_v34 = vadd.f32 %v938_v28, %v937_v19  ;;  %v980_v35 = vrot.slane %v979_v29, 1 }
 0x25b   : > { %v968_v37 = vadd.f32 %v967_v33, %v966_v25  ;;  %v2418_v38 = vmul.f32 0.015625, %v926_v31 }
 0x25c   : > { %v981_v41 = vadd.f32 %v980_v35, %v979_v29  ;;  %v983_v43 = vmul.f32 0.015625, %v939_v34 }
 0x25d   : > { %v984_v45 = vmul.f32 0.015625, %v968_v37  ;;  %v986_v47 = vmul.f32 %v2418_v38, %v2418_v38  ;;  %v1006_v49 = vsub.f32 %v2408_v30, %v2418_v38  ;;  %v992_v50 = vsub.f32 %v2338_v42, %v2418_v38 }
 0x25e   : > { %v985_v51 = vmul.f32 0.015625, %v981_v41  ;;  %v987_v54 = vmul.f32 %v983_v43, %v983_v43  ;;  %v1007_v56 = vsub.f32 %v2413_v26, %v983_v43  ;;  %v993_v57 = vsub.f32 %v2340_v5, %v983_v43 }
 0x25f   : > { %v988_v8 = vsub.f32 %v984_v45, %v986_v47  ;;  %v995_v58 = vsub.f32 %v2350_v11, %v983_v43  ;;  %v1001_v9 = vsub.f32 %v2383_v44, %v983_v43  ;;  %v1003_v60 = vsub.f32 %v2393_v53, %v983_v43 }
 0x260   : > { %v989_v10 = vsub.f32 %v985_v51, %v987_v54  ;;  %v994_v23 = vsub.f32 %v2342_v55, %v2418_v38  ;;  %v1000_v42 = vsub.f32 %v2378_v40, %v2418_v38  ;;  %v1002_v30 = vsub.f32 %v2388_v48, %v2418_v38 }
 0x261   : > { %v990_v20 = vmax.f32 %v988_v8, 0.0  ;;  %v997_v5 = vsub.f32 %v2363_v22, %v983_v43  ;;  %v999_v61 = vsub.f32 %v2373_v32, %v983_v43  ;;  %v1005_v11 = vsub.f32 %v2403_v14, %v983_v43 }
 0x262   : > { %v991_v44 = vmax.f32 %v989_v10, 0.0  ;;  %v996_v53 = vsub.f32 %v2358_v18, %v2418_v38  ;;  %v998_v55 = vsub.f32 %v2368_v27, %v2418_v38  ;;  %v1004_v40 = vsub.f32 %v2398_v59, %v2418_v38 }
 0x263   : > { %v1008_v62 = vadd.f32 1e-05, %v990_v20 }
 0x264   : > { %v1009_v26 = vadd.f32 1e-05, %v991_v44 }
 0x265   : > { %1875 = vrsqrt.f32 %v1008_v62 }
 0x266   : > { %1877 = vrsqrt.f32 %v1009_v26 }
 0x26f   : > { %v1876_v48 = vpop.eup %1875 }
 0x270   : > { %v1878_v22 = vpop.eup %1877  ;;  %v1026_v39 = vmul.f32 %v1876_v48, %v1006_v49  ;;  %v1012_v32 = vmul.f32 %v1876_v48, %v992_v50  ;;  %v1014_v63 = vmul.f32 %v1876_v48, %v994_v23  ;;  %v1020_v14 = vmul.f32 %v1876_v48, %v1000_v42 }
 0x271   : > { %v1027_v46 = vmul.f32 %v1878_v22, %v1007_v56  ;;  %v1013_v0 = vmul.f32 %v1878_v22, %v993_v57  ;;  %v1015_v1 = vmul.f32 %v1878_v22, %v995_v58  ;;  %v1021_v18 = vmul.f32 %v1878_v22, %v1001_v9 }
 0x272   : > { %v1023_v36 = vmul.f32 %v1878_v22, %v1003_v60  ;;  %v1028_v2 = vmax.f32 %v1012_v32, 0.0  ;;  %v1030_v27 = vmax.f32 %v1014_v63, 0.0  ;;  %v1022_v3 = vmul.f32 %v1876_v48, %v1002_v30 }
 0x273   : > { %v1029_v4 = vmax.f32 %v1013_v0, 0.0  ;;  %v1031_v59 = vmax.f32 %v1015_v1, 0.0  ;;  %v1037_v6 = vmax.f32 %v1021_v18, 0.0  ;;  %v1036_v7 = vmax.f32 %v1020_v14, 0.0 }
 0x274   : > { %v1039_v52 = vmax.f32 %v1023_v36, 0.0  ;;  %v1044_v12 = vpack.c.bf16 %v1030_v27, %v1028_v2  ;;  %v1038_v13 = vmax.f32 %v1022_v3, 0.0  ;;  %v1017_v15 = vmul.f32 %v1878_v22, %v997_v5 }
 0x275   : > { %v1045_v16 = vpack.c.bf16 %v1031_v59, %v1029_v4  ;;  %v1019_v17 = vmul.f32 %v1878_v22, %v999_v61  ;;  %v1025_v19 = vmul.f32 %v1878_v22, %v1005_v11  ;;  %v1043_v21 = vmax.f32 %v1027_v46, 0.0 }
 0x276   : > { %v1049_v24 = vpack.c.bf16 %v1039_v52, %v1037_v6  ;;  %v1048_v25 = vpack.c.bf16 %v1038_v13, %v1036_v7  ;;  %v1033_v28 = vmax.f32 %v1017_v15, 0.0  ;;  %v1016_v29 = vmul.f32 %v1876_v48, %v996_v53 }
 0x277   : > { %1276 = vmatprep.mubr.bf16.mxu0 %v1045_v16  ;;  %v1035_v31 = vmax.f32 %v1019_v17, 0.0  ;;  %v1041_v33 = vmax.f32 %v1025_v19, 0.0  ;;  %v1018_v34 = vmul.f32 %v1876_v48, %v998_v55  ;;  %v1024_v35 = vmul.f32 %v1876_v48, %v1004_v40 }
 0x278   : > { %1296 = vmatprep.mubr.bf16.mxu1 %v1049_v24  ;;  %1277 = vmatmul.mubr.bf16.vlgmr.msra.gmra.mrb[16].mxu0 %v1044_v12  ;;  %v1032_v37 = vmax.f32 %v1016_v29, 0.0  ;;  %v1042_v38 = vmax.f32 %v1026_v39, 0.0 }
 0x279   : > { %1297 = vmatmul.mubr.bf16.vlgmr.msra.gmra.mrb[16].mxu1 %v1048_v25  ;;  %v1047_v41 = vpack.c.bf16 %v1035_v31, %v1033_v28  ;;  %v1051_v43 = vpack.c.bf16 %v1043_v21, %v1041_v33  ;;  %v1034_v45 = vmax.f32 %v1018_v34, 0.0  ;;  %v1040_v47 = vmax.f32 %v1024_v35, 0.0 }
 0x27b   : > { %1286 = vmatprep.mubr.bf16.mxu0 %v1047_v41  ;;  %1306 = vmatprep.mubr.bf16.mxu1 %v1051_v43  ;;  %v1046_v49 = vpack.c.bf16 %v1034_v45, %v1032_v37  ;;  %v1050_v50 = vpack.c.bf16 %v1042_v38, %v1040_v47 }
 0x280   : > { %1287 = vmatmul.mubr.bf16.gmra.mrb[20].mxu0 %v1046_v49 }
 0x281   : > { %1307 = vmatmul.mubr.bf16.gmra.mrb[20].mxu1 %v1050_v50 }
 0x34b   : > { %v2446_v51 = vpop.f32.mrb[16].mxu0 }
 0x34c   : > { %v2448_v54 = vpop.f32.mrb[16].mxu1  ;;  %v2450_v56 = vpop.f32.mrb[17].mxu0  ;;  %v1343_v58 = vmul.f32 %v2446_v51, %v2446_v51 }
 0x34d   : > { %v2452_v57 = vpop.f32.mrb[17].mxu1  ;;  %v2454_v8 = vpop.f32.mrb[18].mxu0  ;;  %v1344_v42 = vmul.f32 %v2450_v56, %v2450_v56  ;;  %v1351_v27 = vmul.f32 %v2448_v54, %v2448_v54 }
 0x34e   : > { %v1317_v9 = vadd.f32 %v2454_v8, %v2446_v51  ;;  %v1345_v60 = vmul.f32 %v2454_v8, %v2454_v8  ;;  %v2462_v10 = vpop.f32.mrb[18].mxu1  ;;  %v2464_v23 = vpop.f32.mrb[19].mxu0  ;;  %v1352_v59 = vmul.f32 %v2452_v57, %v2452_v57 }
 0x34f   : > { %v1330_v30 = vadd.f32 %v2464_v23, %v2450_v56  ;;  %v1346_v20 = vmul.f32 %v2464_v23, %v2464_v23  ;;  %v2472_v5 = vpop.f32.mrb[19].mxu1  ;;  %v1353_v52 = vmul.f32 %v2462_v10, %v2462_v10 }
 0x350   : > { %v1359_v61 = vadd.f32 %v1345_v60, %v1343_v58  ;;  %v1354_v15 = vmul.f32 %v2472_v5, %v2472_v5 }
 0x351   : > { %v1372_v11 = vadd.f32 %v1346_v20, %v1344_v42 }
 0x353   : > { %v2474_v44 = vpop.f32.mrb[20].mxu0 }
 0x354   : > { %v1318_v53 = vadd.f32 %v1317_v9, %v2474_v44  ;;  %v1347_v55 = vmul.f32 %v2474_v44, %v2474_v44  ;;  %v2479_v40 = vpop.f32.mrb[20].mxu1  ;;  %v2481_v62 = vpop.f32.mrb[21].mxu0 }
 0x355   : > { %v1331_v26 = vadd.f32 %v1330_v30, %v2481_v62  ;;  %v1348_v48 = vmul.f32 %v2481_v62, %v2481_v62  ;;  %v2486_v22 = vpop.f32.mrb[21].mxu1  ;;  %v2488_v39 = vpop.f32.mrb[22].mxu0  ;;  %v1355_v19 = vmul.f32 %v2479_v40, %v2479_v40 }
 0x356   : > { %v1360_v32 = vadd.f32 %v1359_v61, %v1347_v55  ;;  %v1319_v63 = vadd.f32 %v1318_v53, %v2488_v39  ;;  %v1349_v14 = vmul.f32 %v2488_v39, %v2488_v39  ;;  %v2493_v46 = vpop.f32.mrb[22].mxu1  ;;  %v2495_v0 = vpop.f32.mrb[23].mxu0  ;;  %v1356_v25 = vmul.f32 %v2486_v22, %v2486_v22 }
 0x357   : > { %v1373_v1 = vadd.f32 %v1372_v11, %v1348_v48  ;;  %v1332_v18 = vadd.f32 %v1331_v26, %v2495_v0  ;;  %v1350_v36 = vmul.f32 %v2495_v0, %v2495_v0  ;;  %v2500_v2 = vpop.f32.mrb[23].mxu1  ;;  %v1357_v33 = vmul.f32 %v2493_v46, %v2493_v46 }
 0x358   : > { %v1320_v3 = vadd.f32 %v1319_v63, %v2448_v54  ;;  %v1361_v4 = vadd.f32 %v1360_v32, %v1349_v14  ;;  %v1358_v37 = vmul.f32 %v2500_v2, %v2500_v2 }
 0x359   : > { %v1333_v6 = vadd.f32 %v1332_v18, %v2452_v57  ;;  %v1374_v7 = vadd.f32 %v1373_v1, %v1350_v36 }
 0x35a   : > { %v1362_v12 = vadd.f32 %v1361_v4, %v1351_v27  ;;  %v1321_v13 = vadd.f32 %v1320_v3, %v2462_v10 }
 0x35b   : > { %v1375_v16 = vadd.f32 %v1374_v7, %v1352_v59  ;;  %v1334_v17 = vadd.f32 %v1333_v6, %v2472_v5 }
 0x35c   : > { %v1322_v21 = vadd.f32 %v1321_v13, %v2479_v40  ;;  %v1363_v24 = vadd.f32 %v1362_v12, %v1353_v52 }
 0x35d   : > { %v1335_v28 = vadd.f32 %v1334_v17, %v2486_v22  ;;  %v1376_v29 = vadd.f32 %v1375_v16, %v1354_v15 }
 0x35e   : > { %v1323_v31 = vadd.f32 %v1322_v21, %v2493_v46  ;;  %v1364_v34 = vadd.f32 %v1363_v24, %v1355_v19 }
 0x35f   : > { %v1336_v35 = vadd.f32 %v1335_v28, %v2500_v2  ;;  %v1377_v38 = vadd.f32 %v1376_v29, %v1356_v25 }
 0x360   : > { %v1324_v41 = vrot.slane %v1323_v31, 4  ;;  %v1365_v43 = vadd.f32 %v1364_v34, %v1357_v33 }
 0x361   : > { %v1337_v45 = vrot.slane %v1336_v35, 4  ;;  %v1378_v47 = vadd.f32 %v1377_v38, %v1358_v37 }
 0x362   : > { %v1325_v49 = vadd.f32 %v1324_v41, %v1323_v31  ;;  %v1366_v50 = vrot.slane %v1365_v43, 4 }
 0x363   : > { %v1338_v58 = vadd.f32 %v1337_v45, %v1336_v35  ;;  %v1379_v9 = vrot.slane %v1378_v47, 4 }
 0x364   : > { %v1326_v60 = vrot.slane %v1325_v49, 2  ;;  %v1367_v42 = vadd.f32 %v1366_v50, %v1365_v43 }
 0x365   : > { %v1339_v30 = vrot.slane %v1338_v58, 2  ;;  %v1380_v20 = vadd.f32 %v1379_v9, %v1378_v47 }
 0x366   : > { %v1327_v61 = vadd.f32 %v1326_v60, %v1325_v49  ;;  %v1368_v11 = vrot.slane %v1367_v42, 2 }
 0x367   : > { %v1340_v53 = vadd.f32 %v1339_v30, %v1338_v58  ;;  %v1381_v55 = vrot.slane %v1380_v20, 2 }
 0x368   : > { %v1328_v26 = vrot.slane %v1327_v61, 1  ;;  %v1369_v48 = vadd.f32 %v1368_v11, %v1367_v42 }
 0x369   : > { %v1341_v32 = vrot.slane %v1340_v53, 1  ;;  %v1382_v63 = vadd.f32 %v1381_v55, %v1380_v20 }
 0x36a   : > { %v1329_v14 = vadd.f32 %v1328_v26, %v1327_v61  ;;  %v1370_v1 = vrot.slane %v1369_v48, 1 }
 0x36b   : > { %v1342_v18 = vadd.f32 %v1341_v32, %v1340_v53  ;;  %v1383_v36 = vrot.slane %v1382_v63, 1 }
 0x36c   : > { %v1371_v27 = vadd.f32 %v1370_v1, %v1369_v48  ;;  %v1385_v3 = vmul.f32 0.015625, %v1329_v14 }
 0x36d   : > { %v1384_v4 = vadd.f32 %v1383_v36, %v1382_v63  ;;  %v1386_v59 = vmul.f32 0.015625, %v1342_v18 }
 0x36e   : > { %v1387_v6 = vmul.f32 0.015625, %v1371_v27  ;;  %v1389_v7 = vmul.f32 %v1385_v3, %v1385_v3  ;;  %v1395_v52 = vsub.f32 %v2446_v51, %v1385_v3  ;;  %v1397_v12 = vsub.f32 %v2454_v8, %v1385_v3 }
 0x36f   : > { %v1399_v13 = vsub.f32 %v2474_v44, %v1385_v3  ;;  %v1401_v15 = vsub.f32 %v2488_v39, %v1385_v3  ;;  %v1403_v16 = vsub.f32 %v2448_v54, %v1385_v3  ;;  %v1405_v17 = vsub.f32 %v2462_v10, %v1385_v3 }
 0x370   : > { %v1391_v19 = vsub.f32 %v1387_v6, %v1389_v7  ;;  %v1407_v21 = vsub.f32 %v2479_v40, %v1385_v3  ;;  %v1409_v24 = vsub.f32 %v2493_v46, %v1385_v3  ;;  %v1388_v25 = vmul.f32 0.015625, %v1384_v4 }
 0x371   : > { %v1390_v28 = vmul.f32 %v1386_v59, %v1386_v59  ;;  %v1396_v29 = vsub.f32 %v2450_v56, %v1386_v59  ;;  %v1398_v51 = vsub.f32 %v2464_v23, %v1386_v59  ;;  %v1400_v8 = vsub.f32 %v2481_v62, %v1386_v59 }
 0x372   : > { %v1393_v44 = vmax.f32 %v1391_v19, 0.0  ;;  %v1402_v39 = vsub.f32 %v2495_v0, %v1386_v59  ;;  %v1404_v54 = vsub.f32 %v2452_v57, %v1386_v59  ;;  %v1406_v10 = vsub.f32 %v2472_v5, %v1386_v59 }
 0x373   : > { %v1392_v31 = vsub.f32 %v1388_v25, %v1390_v28  ;;  %v1408_v40 = vsub.f32 %v2486_v22, %v1386_v59  ;;  %v1410_v46 = vsub.f32 %v2500_v2, %v1386_v59 }
 0x374   : > { %v1411_v33 = vadd.f32 1e-05, %v1393_v44 }
 0x375   : > { %v1394_v34 = vmax.f32 %v1392_v31, 0.0 }
 0x376   : > { %1879 = vrsqrt.f32 %v1411_v33 }
 0x377   : > { %v1412_v56 = vadd.f32 1e-05, %v1394_v34 }
 0x379   : > { %1881 = vrsqrt.f32 %v1412_v56 }
 0x380   : > { %v1880_v23 = vpop.eup %1879 }
 0x381   : > { %v1415_v62 = vmul.f32 %v1880_v23, %v1395_v52  ;;  %v1417_v35 = vmul.f32 %v1880_v23, %v1397_v12  ;;  %v1419_v37 = vmul.f32 %v1880_v23, %v1399_v13  ;;  %v1421_v0 = vmul.f32 %v1880_v23, %v1401_v15 }
 0x382   : > { %v1423_v38 = vmul.f32 %v1880_v23, %v1403_v16  ;;  %v1425_v57 = vmul.f32 %v1880_v23, %v1405_v17  ;;  %v1427_v41 = vmul.f32 %v1880_v23, %v1407_v21  ;;  %v1429_v5 = vmul.f32 %v1880_v23, %v1409_v24 }
 0x383   : > { %v1882_v43 = vpop.eup %1881 }
 0x384   : > { %v1416_v45 = vmul.f32 %v1882_v43, %v1396_v29  ;;  %v1418_v22 = vmul.f32 %v1882_v43, %v1398_v51  ;;  %v1420_v47 = vmul.f32 %v1882_v43, %v1400_v8  ;;  %v1422_v2 = vmul.f32 %v1882_v43, %v1402_v39 }
 0x385   : > { %v1424_v49 = vmul.f32 %v1882_v43, %v1404_v54  ;;  %v1426_v50 = vmul.f32 %v1882_v43, %v1406_v10  ;;  %v1428_v58 = vmul.f32 %v1882_v43, %v1408_v40  ;;  %v1430_v9 = vmul.f32 %v1882_v43, %v1410_v46 }
 0x386   : > { %v1667_v60 = vpack.c.bf16 %v1416_v45, %v1415_v62  ;;  %v1668_v42 = vpack.c.bf16 %v1418_v22, %v1417_v35  ;;  %v1669_v30 = vpack.c.bf16 %v1420_v47, %v1419_v37  ;;  %v1670_v20 = vpack.c.bf16 %v1422_v2, %v1421_v0 }
 0x387   : > { %v1671_v61 = vpack.c.bf16 %v1424_v49, %v1423_v38  ;;  %v1672_v11 = vpack.c.bf16 %v1426_v50, %v1425_v57  ;;  %v1673_v53 = vpack.c.bf16 %v1428_v58, %v1427_v41  ;;  %v1674_v55 = vpack.c.bf16 %v1430_v9, %v1429_v5 }
 0x388   : > { %1479 = vst [vmem:[%s197_s5] sm:$0xff] %v1667_v60  ;;  %1480 = vst [vmem:[%s197_s5 + $0x8] sm:$0xff] %v1668_v42 }
 0x389   : > { %1481 = vst [vmem:[%s197_s5 + $0x10] sm:$0xff] %v1669_v30  ;;  %1482 = vst [vmem:[%s197_s5 + $0x18] sm:$0xff] %v1670_v20 }
 0x38a   : > { %1483 = vst [vmem:[%s197_s5 + $0x20] sm:$0xff] %v1671_v61  ;;  %1484 = vst [vmem:[%s197_s5 + $0x28] sm:$0xff] %v1672_v11 }
 0x38b   : > { %1485 = vst [vmem:[%s197_s5 + $0x30] sm:$0xff] %v1673_v53  ;;  %1486 = vst [vmem:[%s197_s5 + $0x38] sm:$0xff] %v1674_v55 }
 0x38c PF: > { %s14_s15 = sadd.s32 1, %s1889_s15  }
 0x38d   : > { %p11_p4 = scmp.ge.s32.totalorder %s14_s15, 4  }
 0x38f   :  { %13 = sbr.rel (!%p11_p4) target bundleno = 1 (0x1), region = 66 }

</bundles_post_ra>
